<compile_context>
chip_gen: v7x
topology: tpu7x:2x2x1
jax: 0.10.0
libtpu: 0.0.40
codegen_flags: <defaults>
</compile_context>

<pallas_src>
import functools

import jax
import jax.numpy as jnp
from jax.experimental import pallas as pl
from jax.experimental.pallas import tpu as pltpu


# ---------------------------------------------------------------------------
# Fused Pallas kernel: n_layers LSTM + fc head
# ---------------------------------------------------------------------------

def fused_lstm_fc_kernel(x_ref, *refs, n_layers, T, B, H):
    """Fused forward pass.

    x_ref:  [T*B, Din]  time-major flattened input sequence (VMEM)
    refs:   wih_0, whh_0, b_0, ..., wih_{L-1}, whh_{L-1}, b_{L-1},
            w1, b1, w2, b2, out_ref
      wih_l: [Din_l, 4H]  (Din_0 = enc_in_dim, Din_{l>0} = H)
      whh_l: [H, 4H]
      b_l:   [1, 4H]      (= b_ih + b_hh)
      w1: [H, 16], b1: [1, 16], w2: [16, O], b2: [1, O]
    out_ref: [B, O]
    """
    weight_refs = refs[:-1]
    out_ref = refs[-1]
    lstm_refs = weight_refs[:3 * n_layers]
    w1_ref, b1_ref, w2_ref, b2_ref = weight_refs[3 * n_layers:]

    seq = x_ref[...]                      # [T*B, Din]  (time-major)
    h = None

    for layer in range(n_layers):
        wih = lstm_refs[3 * layer][...]
        whh = lstm_refs[3 * layer + 1][...]
        b = lstm_refs[3 * layer + 2][...]

        # Hoisted input projection + bias: one MXU matmul for all timesteps.
        xw = jnp.dot(seq, wih, preferred_element_type=jnp.float32) + b   # [T*B, 4H]

        h = jnp.zeros((B, H), jnp.float32)
        c = jnp.zeros((B, H), jnp.float32)
        hs = []

        # Static unroll over T (small, fixed) — only h @ W_hh + gate math on the serial path.
        for t in range(T):
            gates = xw[t * B:(t + 1) * B, :] + jnp.dot(
                h, whh, preferred_element_type=jnp.float32)               # [B, 4H]
            i = jax.nn.sigmoid(gates[:, 0:H])
            f = jax.nn.sigmoid(gates[:, H:2 * H])
            g = jnp.tanh(gates[:, 2 * H:3 * H])
            o = jax.nn.sigmoid(gates[:, 3 * H:4 * H])
            c = f * c + i * g
            h = o * jnp.tanh(c)
            hs.append(h)

        if layer + 1 < n_layers:
            # Assemble next layer's time-major input once (kept in vregs, no HBM traffic).
            seq = jnp.concatenate(hs, axis=0)                             # [T*B, H]
        # Last layer: only h at t = T-1 is needed; sequence never materialized.

    # fc head: Linear(H,16) -> ReLU -> (Dropout = identity at eval) -> Linear(16,O)
    z = jnp.dot(h, w1_ref[...], preferred_element_type=jnp.float32) + b1_ref[...]
    z = jnp.maximum(z, 0.0)
    out_ref[...] = jnp.dot(z, w2_ref[...], preferred_element_type=jnp.float32) + b2_ref[...]


# ---------------------------------------------------------------------------
# Wrapper
# ---------------------------------------------------------------------------

def _vmem_spec():
    return pl.BlockSpec(memory_space=pltpu.MemorySpace.VMEM)


def lstm_int_forward(enc_input, params):
    """Forward pass of LSTMInt. Returns [B, 1, 1, output_dim]."""
    x = enc_input.astype(jnp.float32)
    B, T, Din = x.shape

    lstm_ws = params["lstm"]
    w1, b1, w2, b2 = params["fc"]
    n_layers = len(lstm_ws)
    H = lstm_ws[0][1].shape[0]
    O = w2.shape[1]

    # Time-major flattening (done once in XLA, outside the kernel) so that per-timestep rows
    # of the hoisted input projection are contiguous sublane blocks.
    x_tm = jnp.transpose(x, (1, 0, 2)).reshape(T * B, Din)

    flat_weights = []
    for (wih, whh, b) in lstm_ws:
        flat_weights += [wih, whh, b]
    flat_weights += [w1, b1, w2, b2]

    kernel = functools.partial(fused_lstm_fc_kernel, n_layers=n_layers, T=T, B=B, H=H)

    out = pl.pallas_call(
        kernel,
        out_shape=jax.ShapeDtypeStruct((B, O), jnp.float32),
        in_specs=[_vmem_spec() for _ in range(1 + len(flat_weights))],
        out_specs=_vmem_spec(),
    )(x_tm, *flat_weights)

    # output = fc(enc_last_output) -> [B, 1, O]; outputs = output.unsqueeze(1) -> [B, 1, 1, O]
    return out[:, None, None, :]


# ---------------------------------------------------------------------------
# Deterministic parameter init (shapes from __init__)
# ---------------------------------------------------------------------------

def init_params(key, enc_in_dim, enc_out_dim, output_dim, n_layers):
    k = float(1.0 / (enc_out_dim ** 0.5))
    lstm_params = []
    in_dim = enc_in_dim
    for _ in range(n_layers):
        key, k1, k2, k3, k4 = jax.random.split(key, 5)
        wih = jax.random.uniform(k1, (in_dim, 4 * enc_out_dim), jnp.float32, -k, k)
        whh = jax.random.uniform(k2, (enc_out_dim, 4 * enc_out_dim), jnp.float32, -k, k)
        b_ih = jax.random.uniform(k3, (4 * enc_out_dim,), jnp.float32, -k, k)
        b_hh = jax.random.uniform(k4, (4 * enc_out_dim,), jnp.float32, -k, k)
        lstm_params.append((wih, whh, (b_ih + b_hh)[None, :]))
        in_dim = enc_out_dim

    key, k1, k2, k3, k4 = jax.random.split(key, 5)
    k_fc1 = float(1.0 / (enc_out_dim ** 0.5))
    k_fc2 = float(1.0 / (16.0 ** 0.5))
    w1 = jax.random.uniform(k1, (enc_out_dim, 16), jnp.float32, -k_fc1, k_fc1)
    b1 = jax.random.uniform(k2, (1, 16), jnp.float32, -k_fc1, k_fc1)
    w2 = jax.random.uniform(k3, (16, output_dim), jnp.float32, -k_fc2, k_fc2)
    b2 = jax.random.uniform(k4, (1, output_dim), jnp.float32, -k_fc2, k_fc2)

    return {"lstm": lstm_params, "fc": (w1, b1, w2, b2)}


# ---------------------------------------------------------------------------
# Pure-JAX reference (for correctness check)
# ---------------------------------------------------------------------------

def reference_forward(enc_input, params):
    x = enc_input.astype(jnp.float32)
    B, T, _ = x.shape
    for (wih, whh, b) in params["lstm"]:
        H = whh.shape[0]
        h = jnp.zeros((B, H), jnp.float32)
        c = jnp.zeros((B, H), jnp.float32)
        outs = []
        for t in range(T):
            gates = x[:, t, :] @ wih + h @ whh + b
            i = jax.nn.sigmoid(gates[:, 0:H])
            f = jax.nn.sigmoid(gates[:, H:2 * H])
            g = jnp.tanh(gates[:, 2 * H:3 * H])
            o = jax.nn.sigmoid(gates[:, 3 * H:4 * H])
            c = f * c + i * g
            h = o * jnp.tanh(c)
            outs.append(h)
        x = jnp.stack(outs, axis=1)
    h_last = x[:, -1, :]
    w1, b1, w2, b2 = params["fc"]
    z = jnp.maximum(h_last @ w1 + b1, 0.0)
    out = z @ w2 + b2
    return out[:, None, None, :]


# ---------------------------------------------------------------------------

if __name__ == "__main__":
    # model_opts (small, forward-consistent shapes)
    B, T = 2, 8
    enc_in_dim = 4        # bbox features
    enc_out_dim = 32
    output_dim = 2
    n_layers = 2

    key = jax.random.PRNGKey(0)
    key, pkey, xkey = jax.random.split(key, 3)
    params = init_params(pkey, enc_in_dim, enc_out_dim, output_dim, n_layers)
    enc_input = jax.random.normal(xkey, (B, T, enc_in_dim), jnp.float32)

    out = lstm_int_forward(enc_input, params)
    out = jax.block_until_ready(out)

    ref = reference_forward(enc_input, params)
    assert out.shape == (B, 1, 1, output_dim), out.shape
    assert jnp.allclose(out, ref, atol=1e-4, rtol=1e-4), (out, ref)

    print("KERNEL_OK")
</pallas_src>

<mosaic_0001>
module attributes {stable_mosaic.version = 11 : i64} {
  func.func @fused_lstm_fc_kernel(%arg0: memref<16x4xf32, #tpu.memory_space<vmem>>, %arg1: memref<4x128xf32, #tpu.memory_space<vmem>>, %arg2: memref<32x128xf32, #tpu.memory_space<vmem>>, %arg3: memref<1x128xf32, #tpu.memory_space<vmem>>, %arg4: memref<32x128xf32, #tpu.memory_space<vmem>>, %arg5: memref<32x128xf32, #tpu.memory_space<vmem>>, %arg6: memref<1x128xf32, #tpu.memory_space<vmem>>, %arg7: memref<32x16xf32, #tpu.memory_space<vmem>>, %arg8: memref<1x16xf32, #tpu.memory_space<vmem>>, %arg9: memref<16x2xf32, #tpu.memory_space<vmem>>, %arg10: memref<1x2xf32, #tpu.memory_space<vmem>>, %arg11: memref<2x2xf32, #tpu.memory_space<vmem>>) attributes {dimension_semantics = [], scalar_prefetch = 0 : i64, scratch_operands = 0 : i64, tpu.core_type = #tpu.core_type<tc>} {
    %c0 = arith.constant 0 : index
    %c0_0 = arith.constant 0 : index
    %0 = vector.load %arg0[%c0, %c0_0] : memref<16x4xf32, #tpu.memory_space<vmem>>, vector<16x4xf32>
    %c0_1 = arith.constant 0 : index
    %c0_2 = arith.constant 0 : index
    %1 = vector.load %arg1[%c0_1, %c0_2] : memref<4x128xf32, #tpu.memory_space<vmem>>, vector<4x128xf32>
    %c0_3 = arith.constant 0 : index
    %c0_4 = arith.constant 0 : index
    %2 = vector.load %arg2[%c0_3, %c0_4] : memref<32x128xf32, #tpu.memory_space<vmem>>, vector<32x128xf32>
    %c0_5 = arith.constant 0 : index
    %c0_6 = arith.constant 0 : index
    %3 = vector.load %arg3[%c0_5, %c0_6] : memref<1x128xf32, #tpu.memory_space<vmem>>, vector<1x128xf32>
    %cst = arith.constant dense<0.000000e+00> : vector<16x128xf32>
    %4 = tpu.matmul %0, %1, %cst {dimension_numbers = #tpu.dot_dimension_numbers<[1], [0], [0], [1], [0, 0, 1, 1], [], []>} : vector<16x4xf32>, vector<4x128xf32>, vector<16x128xf32> -> vector<16x128xf32>
    %5 = vector.broadcast %3 : vector<1x128xf32> to vector<16x128xf32>
    %6 = arith.addf %4, %5 : vector<16x128xf32>
    %cst_7 = arith.constant 0.000000e+00 : f32
    %7 = vector.broadcast %cst_7 : f32 to vector<2x32xf32>
    %cst_8 = arith.constant 0.000000e+00 : f32
    %8 = vector.broadcast %cst_8 : f32 to vector<2x32xf32>
    %9 = vector.extract_strided_slice %6 {offsets = [0, 0], sizes = [2, 128], strides = [1, 1]} : vector<16x128xf32> to vector<2x128xf32>
    %cst_9 = arith.constant dense<0.000000e+00> : vector<2x128xf32>
    %10 = tpu.matmul %7, %2, %cst_9 {dimension_numbers = #tpu.dot_dimension_numbers<[1], [0], [0], [1], [0, 0, 1, 1], [], []>} : vector<2x32xf32>, vector<32x128xf32>, vector<2x128xf32> -> vector<2x128xf32>
    %11 = arith.addf %9, %10 : vector<2x128xf32>
    %12 = vector.extract_strided_slice %11 {offsets = [0, 0], sizes = [2, 32], strides = [1, 1]} : vector<2x128xf32> to vector<2x32xf32>
    %13 = arith.negf %12 : vector<2x32xf32>
    %14 = math.exp %13 : vector<2x32xf32>
    %cst_10 = arith.constant 1.000000e+00 : f32
    %15 = vector.broadcast %cst_10 : f32 to vector<2x32xf32>
    %16 = arith.addf %15, %14 : vector<2x32xf32>
    %17 = arith.divf %15, %16 : vector<2x32xf32>
    %18 = vector.extract_strided_slice %11 {offsets = [0, 32], sizes = [2, 32], strides = [1, 1]} : vector<2x128xf32> to vector<2x32xf32>
    %19 = arith.negf %18 : vector<2x32xf32>
    %20 = math.exp %19 : vector<2x32xf32>
    %cst_11 = arith.constant 1.000000e+00 : f32
    %21 = vector.broadcast %cst_11 : f32 to vector<2x32xf32>
    %22 = arith.addf %21, %20 : vector<2x32xf32>
    %23 = arith.divf %21, %22 : vector<2x32xf32>
    %24 = vector.extract_strided_slice %11 {offsets = [0, 64], sizes = [2, 32], strides = [1, 1]} : vector<2x128xf32> to vector<2x32xf32>
    %25 = math.tanh %24 : vector<2x32xf32>
    %26 = vector.extract_strided_slice %11 {offsets = [0, 96], sizes = [2, 32], strides = [1, 1]} : vector<2x128xf32> to vector<2x32xf32>
    %27 = arith.negf %26 : vector<2x32xf32>
    %28 = math.exp %27 : vector<2x32xf32>
    %cst_12 = arith.constant 1.000000e+00 : f32
    %29 = vector.broadcast %cst_12 : f32 to vector<2x32xf32>
    %30 = arith.addf %29, %28 : vector<2x32xf32>
    %31 = arith.divf %29, %30 : vector<2x32xf32>
    %32 = arith.mulf %23, %8 : vector<2x32xf32>
    %33 = arith.mulf %17, %25 : vector<2x32xf32>
    %34 = arith.addf %32, %33 : vector<2x32xf32>
    %35 = math.tanh %34 : vector<2x32xf32>
    %36 = arith.mulf %31, %35 : vector<2x32xf32>
    %37 = vector.extract_strided_slice %6 {offsets = [2, 0], sizes = [2, 128], strides = [1, 1]} : vector<16x128xf32> to vector<2x128xf32>
    %cst_13 = arith.constant dense<0.000000e+00> : vector<2x128xf32>
    %38 = tpu.matmul %36, %2, %cst_13 {dimension_numbers = #tpu.dot_dimension_numbers<[1], [0], [0], [1], [0, 0, 1, 1], [], []>} : vector<2x32xf32>, vector<32x128xf32>, vector<2x128xf32> -> vector<2x128xf32>
    %39 = arith.addf %37, %38 : vector<2x128xf32>
    %40 = vector.extract_strided_slice %39 {offsets = [0, 0], sizes = [2, 32], strides = [1, 1]} : vector<2x128xf32> to vector<2x32xf32>
    %41 = arith.negf %40 : vector<2x32xf32>
    %42 = math.exp %41 : vector<2x32xf32>
    %cst_14 = arith.constant 1.000000e+00 : f32
    %43 = vector.broadcast %cst_14 : f32 to vector<2x32xf32>
    %44 = arith.addf %43, %42 : vector<2x32xf32>
    %45 = arith.divf %43, %44 : vector<2x32xf32>
    %46 = vector.extract_strided_slice %39 {offsets = [0, 32], sizes = [2, 32], strides = [1, 1]} : vector<2x128xf32> to vector<2x32xf32>
    %47 = arith.negf %46 : vector<2x32xf32>
    %48 = math.exp %47 : vector<2x32xf32>
    %cst_15 = arith.constant 1.000000e+00 : f32
    %49 = vector.broadcast %cst_15 : f32 to vector<2x32xf32>
    %50 = arith.addf %49, %48 : vector<2x32xf32>
    %51 = arith.divf %49, %50 : vector<2x32xf32>
    %52 = vector.extract_strided_slice %39 {offsets = [0, 64], sizes = [2, 32], strides = [1, 1]} : vector<2x128xf32> to vector<2x32xf32>
    %53 = math.tanh %52 : vector<2x32xf32>
    %54 = vector.extract_strided_slice %39 {offsets = [0, 96], sizes = [2, 32], strides = [1, 1]} : vector<2x128xf32> to vector<2x32xf32>
    %55 = arith.negf %54 : vector<2x32xf32>
    %56 = math.exp %55 : vector<2x32xf32>
    %cst_16 = arith.constant 1.000000e+00 : f32
    %57 = vector.broadcast %cst_16 : f32 to vector<2x32xf32>
    %58 = arith.addf %57, %56 : vector<2x32xf32>
    %59 = arith.divf %57, %58 : vector<2x32xf32>
    %60 = arith.mulf %51, %34 : vector<2x32xf32>
    %61 = arith.mulf %45, %53 : vector<2x32xf32>
    %62 = arith.addf %60, %61 : vector<2x32xf32>
    %63 = math.tanh %62 : vector<2x32xf32>
    %64 = arith.mulf %59, %63 : vector<2x32xf32>
    %65 = vector.extract_strided_slice %6 {offsets = [4, 0], sizes = [2, 128], strides = [1, 1]} : vector<16x128xf32> to vector<2x128xf32>
    %cst_17 = arith.constant dense<0.000000e+00> : vector<2x128xf32>
    %66 = tpu.matmul %64, %2, %cst_17 {dimension_numbers = #tpu.dot_dimension_numbers<[1], [0], [0], [1], [0, 0, 1, 1], [], []>} : vector<2x32xf32>, vector<32x128xf32>, vector<2x128xf32> -> vector<2x128xf32>
    %67 = arith.addf %65, %66 : vector<2x128xf32>
    %68 = vector.extract_strided_slice %67 {offsets = [0, 0], sizes = [2, 32], strides = [1, 1]} : vector<2x128xf32> to vector<2x32xf32>
    %69 = arith.negf %68 : vector<2x32xf32>
    %70 = math.exp %69 : vector<2x32xf32>
    %cst_18 = arith.constant 1.000000e+00 : f32
    %71 = vector.broadcast %cst_18 : f32 to vector<2x32xf32>
    %72 = arith.addf %71, %70 : vector<2x32xf32>
    %73 = arith.divf %71, %72 : vector<2x32xf32>
    %74 = vector.extract_strided_slice %67 {offsets = [0, 32], sizes = [2, 32], strides = [1, 1]} : vector<2x128xf32> to vector<2x32xf32>
    %75 = arith.negf %74 : vector<2x32xf32>
    %76 = math.exp %75 : vector<2x32xf32>
    %cst_19 = arith.constant 1.000000e+00 : f32
    %77 = vector.broadcast %cst_19 : f32 to vector<2x32xf32>
    %78 = arith.addf %77, %76 : vector<2x32xf32>
    %79 = arith.divf %77, %78 : vector<2x32xf32>
    %80 = vector.extract_strided_slice %67 {offsets = [0, 64], sizes = [2, 32], strides = [1, 1]} : vector<2x128xf32> to vector<2x32xf32>
    %81 = math.tanh %80 : vector<2x32xf32>
    %82 = vector.extract_strided_slice %67 {offsets = [0, 96], sizes = [2, 32], strides = [1, 1]} : vector<2x128xf32> to vector<2x32xf32>
    %83 = arith.negf %82 : vector<2x32xf32>
    %84 = math.exp %83 : vector<2x32xf32>
    %cst_20 = arith.constant 1.000000e+00 : f32
    %85 = vector.broadcast %cst_20 : f32 to vector<2x32xf32>
    %86 = arith.addf %85, %84 : vector<2x32xf32>
    %87 = arith.divf %85, %86 : vector<2x32xf32>
    %88 = arith.mulf %79, %62 : vector<2x32xf32>
    %89 = arith.mulf %73, %81 : vector<2x32xf32>
    %90 = arith.addf %88, %89 : vector<2x32xf32>
    %91 = math.tanh %90 : vector<2x32xf32>
    %92 = arith.mulf %87, %91 : vector<2x32xf32>
    %93 = vector.extract_strided_slice %6 {offsets = [6, 0], sizes = [2, 128], strides = [1, 1]} : vector<16x128xf32> to vector<2x128xf32>
    %cst_21 = arith.constant dense<0.000000e+00> : vector<2x128xf32>
    %94 = tpu.matmul %92, %2, %cst_21 {dimension_numbers = #tpu.dot_dimension_numbers<[1], [0], [0], [1], [0, 0, 1, 1], [], []>} : vector<2x32xf32>, vector<32x128xf32>, vector<2x128xf32> -> vector<2x128xf32>
    %95 = arith.addf %93, %94 : vector<2x128xf32>
    %96 = vector.extract_strided_slice %95 {offsets = [0, 0], sizes = [2, 32], strides = [1, 1]} : vector<2x128xf32> to vector<2x32xf32>
    %97 = arith.negf %96 : vector<2x32xf32>
    %98 = math.exp %97 : vector<2x32xf32>
    %cst_22 = arith.constant 1.000000e+00 : f32
    %99 = vector.broadcast %cst_22 : f32 to vector<2x32xf32>
    %100 = arith.addf %99, %98 : vector<2x32xf32>
    %101 = arith.divf %99, %100 : vector<2x32xf32>
    %102 = vector.extract_strided_slice %95 {offsets = [0, 32], sizes = [2, 32], strides = [1, 1]} : vector<2x128xf32> to vector<2x32xf32>
    %103 = arith.negf %102 : vector<2x32xf32>
    %104 = math.exp %103 : vector<2x32xf32>
    %cst_23 = arith.constant 1.000000e+00 : f32
    %105 = vector.broadcast %cst_23 : f32 to vector<2x32xf32>
    %106 = arith.addf %105, %104 : vector<2x32xf32>
    %107 = arith.divf %105, %106 : vector<2x32xf32>
    %108 = vector.extract_strided_slice %95 {offsets = [0, 64], sizes = [2, 32], strides = [1, 1]} : vector<2x128xf32> to vector<2x32xf32>
    %109 = math.tanh %108 : vector<2x32xf32>
    %110 = vector.extract_strided_slice %95 {offsets = [0, 96], sizes = [2, 32], strides = [1, 1]} : vector<2x128xf32> to vector<2x32xf32>
    %111 = arith.negf %110 : vector<2x32xf32>
    %112 = math.exp %111 : vector<2x32xf32>
    %cst_24 = arith.constant 1.000000e+00 : f32
    %113 = vector.broadcast %cst_24 : f32 to vector<2x32xf32>
    %114 = arith.addf %113, %112 : vector<2x32xf32>
    %115 = arith.divf %113, %114 : vector<2x32xf32>
    %116 = arith.mulf %107, %90 : vector<2x32xf32>
    %117 = arith.mulf %101, %109 : vector<2x32xf32>
    %118 = arith.addf %116, %117 : vector<2x32xf32>
    %119 = math.tanh %118 : vector<2x32xf32>
    %120 = arith.mulf %115, %119 : vector<2x32xf32>
    %121 = vector.extract_strided_slice %6 {offsets = [8, 0], sizes = [2, 128], strides = [1, 1]} : vector<16x128xf32> to vector<2x128xf32>
    %cst_25 = arith.constant dense<0.000000e+00> : vector<2x128xf32>
    %122 = tpu.matmul %120, %2, %cst_25 {dimension_numbers = #tpu.dot_dimension_numbers<[1], [0], [0], [1], [0, 0, 1, 1], [], []>} : vector<2x32xf32>, vector<32x128xf32>, vector<2x128xf32> -> vector<2x128xf32>
    %123 = arith.addf %121, %122 : vector<2x128xf32>
    %124 = vector.extract_strided_slice %123 {offsets = [0, 0], sizes = [2, 32], strides = [1, 1]} : vector<2x128xf32> to vector<2x32xf32>
    %125 = arith.negf %124 : vector<2x32xf32>
    %126 = math.exp %125 : vector<2x32xf32>
    %cst_26 = arith.constant 1.000000e+00 : f32
    %127 = vector.broadcast %cst_26 : f32 to vector<2x32xf32>
    %128 = arith.addf %127, %126 : vector<2x32xf32>
    %129 = arith.divf %127, %128 : vector<2x32xf32>
    %130 = vector.extract_strided_slice %123 {offsets = [0, 32], sizes = [2, 32], strides = [1, 1]} : vector<2x128xf32> to vector<2x32xf32>
    %131 = arith.negf %130 : vector<2x32xf32>
    %132 = math.exp %131 : vector<2x32xf32>
    %cst_27 = arith.constant 1.000000e+00 : f32
    %133 = vector.broadcast %cst_27 : f32 to vector<2x32xf32>
    %134 = arith.addf %133, %132 : vector<2x32xf32>
    %135 = arith.divf %133, %134 : vector<2x32xf32>
    %136 = vector.extract_strided_slice %123 {offsets = [0, 64], sizes = [2, 32], strides = [1, 1]} : vector<2x128xf32> to vector<2x32xf32>
    %137 = math.tanh %136 : vector<2x32xf32>
    %138 = vector.extract_strided_slice %123 {offsets = [0, 96], sizes = [2, 32], strides = [1, 1]} : vector<2x128xf32> to vector<2x32xf32>
    %139 = arith.negf %138 : vector<2x32xf32>
    %140 = math.exp %139 : vector<2x32xf32>
    %cst_28 = arith.constant 1.000000e+00 : f32
    %141 = vector.broadcast %cst_28 : f32 to vector<2x32xf32>
    %142 = arith.addf %141, %140 : vector<2x32xf32>
    %143 = arith.divf %141, %142 : vector<2x32xf32>
    %144 = arith.mulf %135, %118 : vector<2x32xf32>
    %145 = arith.mulf %129, %137 : vector<2x32xf32>
    %146 = arith.addf %144, %145 : vector<2x32xf32>
    %147 = math.tanh %146 : vector<2x32xf32>
    %148 = arith.mulf %143, %147 : vector<2x32xf32>
    %149 = vector.extract_strided_slice %6 {offsets = [10, 0], sizes = [2, 128], strides = [1, 1]} : vector<16x128xf32> to vector<2x128xf32>
    %cst_29 = arith.constant dense<0.000000e+00> : vector<2x128xf32>
    %150 = tpu.matmul %148, %2, %cst_29 {dimension_numbers = #tpu.dot_dimension_numbers<[1], [0], [0], [1], [0, 0, 1, 1], [], []>} : vector<2x32xf32>, vector<32x128xf32>, vector<2x128xf32> -> vector<2x128xf32>
    %151 = arith.addf %149, %150 : vector<2x128xf32>
    %152 = vector.extract_strided_slice %151 {offsets = [0, 0], sizes = [2, 32], strides = [1, 1]} : vector<2x128xf32> to vector<2x32xf32>
    %153 = arith.negf %152 : vector<2x32xf32>
    %154 = math.exp %153 : vector<2x32xf32>
    %cst_30 = arith.constant 1.000000e+00 : f32
    %155 = vector.broadcast %cst_30 : f32 to vector<2x32xf32>
    %156 = arith.addf %155, %154 : vector<2x32xf32>
    %157 = arith.divf %155, %156 : vector<2x32xf32>
    %158 = vector.extract_strided_slice %151 {offsets = [0, 32], sizes = [2, 32], strides = [1, 1]} : vector<2x128xf32> to vector<2x32xf32>
    %159 = arith.negf %158 : vector<2x32xf32>
    %160 = math.exp %159 : vector<2x32xf32>
    %cst_31 = arith.constant 1.000000e+00 : f32
    %161 = vector.broadcast %cst_31 : f32 to vector<2x32xf32>
    %162 = arith.addf %161, %160 : vector<2x32xf32>
    %163 = arith.divf %161, %162 : vector<2x32xf32>
    %164 = vector.extract_strided_slice %151 {offsets = [0, 64], sizes = [2, 32], strides = [1, 1]} : vector<2x128xf32> to vector<2x32xf32>
    %165 = math.tanh %164 : vector<2x32xf32>
    %166 = vector.extract_strided_slice %151 {offsets = [0, 96], sizes = [2, 32], strides = [1, 1]} : vector<2x128xf32> to vector<2x32xf32>
    %167 = arith.negf %166 : vector<2x32xf32>
    %168 = math.exp %167 : vector<2x32xf32>
    %cst_32 = arith.constant 1.000000e+00 : f32
    %169 = vector.broadcast %cst_32 : f32 to vector<2x32xf32>
    %170 = arith.addf %169, %168 : vector<2x32xf32>
    %171 = arith.divf %169, %170 : vector<2x32xf32>
    %172 = arith.mulf %163, %146 : vector<2x32xf32>
    %173 = arith.mulf %157, %165 : vector<2x32xf32>
    %174 = arith.addf %172, %173 : vector<2x32xf32>
    %175 = math.tanh %174 : vector<2x32xf32>
    %176 = arith.mulf %171, %175 : vector<2x32xf32>
    %177 = vector.extract_strided_slice %6 {offsets = [12, 0], sizes = [2, 128], strides = [1, 1]} : vector<16x128xf32> to vector<2x128xf32>
    %cst_33 = arith.constant dense<0.000000e+00> : vector<2x128xf32>
    %178 = tpu.matmul %176, %2, %cst_33 {dimension_numbers = #tpu.dot_dimension_numbers<[1], [0], [0], [1], [0, 0, 1, 1], [], []>} : vector<2x32xf32>, vector<32x128xf32>, vector<2x128xf32> -> vector<2x128xf32>
    %179 = arith.addf %177, %178 : vector<2x128xf32>
    %180 = vector.extract_strided_slice %179 {offsets = [0, 0], sizes = [2, 32], strides = [1, 1]} : vector<2x128xf32> to vector<2x32xf32>
    %181 = arith.negf %180 : vector<2x32xf32>
    %182 = math.exp %181 : vector<2x32xf32>
    %cst_34 = arith.constant 1.000000e+00 : f32
    %183 = vector.broadcast %cst_34 : f32 to vector<2x32xf32>
    %184 = arith.addf %183, %182 : vector<2x32xf32>
    %185 = arith.divf %183, %184 : vector<2x32xf32>
    %186 = vector.extract_strided_slice %179 {offsets = [0, 32], sizes = [2, 32], strides = [1, 1]} : vector<2x128xf32> to vector<2x32xf32>
    %187 = arith.negf %186 : vector<2x32xf32>
    %188 = math.exp %187 : vector<2x32xf32>
    %cst_35 = arith.constant 1.000000e+00 : f32
    %189 = vector.broadcast %cst_35 : f32 to vector<2x32xf32>
    %190 = arith.addf %189, %188 : vector<2x32xf32>
    %191 = arith.divf %189, %190 : vector<2x32xf32>
    %192 = vector.extract_strided_slice %179 {offsets = [0, 64], sizes = [2, 32], strides = [1, 1]} : vector<2x128xf32> to vector<2x32xf32>
    %193 = math.tanh %192 : vector<2x32xf32>
    %194 = vector.extract_strided_slice %179 {offsets = [0, 96], sizes = [2, 32], strides = [1, 1]} : vector<2x128xf32> to vector<2x32xf32>
    %195 = arith.negf %194 : vector<2x32xf32>
    %196 = math.exp %195 : vector<2x32xf32>
    %cst_36 = arith.constant 1.000000e+00 : f32
    %197 = vector.broadcast %cst_36 : f32 to vector<2x32xf32>
    %198 = arith.addf %197, %196 : vector<2x32xf32>
    %199 = arith.divf %197, %198 : vector<2x32xf32>
    %200 = arith.mulf %191, %174 : vector<2x32xf32>
    %201 = arith.mulf %185, %193 : vector<2x32xf32>
    %202 = arith.addf %200, %201 : vector<2x32xf32>
    %203 = math.tanh %202 : vector<2x32xf32>
    %204 = arith.mulf %199, %203 : vector<2x32xf32>
    %205 = vector.extract_strided_slice %6 {offsets = [14, 0], sizes = [2, 128], strides = [1, 1]} : vector<16x128xf32> to vector<2x128xf32>
    %cst_37 = arith.constant dense<0.000000e+00> : vector<2x128xf32>
    %206 = tpu.matmul %204, %2, %cst_37 {dimension_numbers = #tpu.dot_dimension_numbers<[1], [0], [0], [1], [0, 0, 1, 1], [], []>} : vector<2x32xf32>, vector<32x128xf32>, vector<2x128xf32> -> vector<2x128xf32>
    %207 = arith.addf %205, %206 : vector<2x128xf32>
    %208 = vector.extract_strided_slice %207 {offsets = [0, 0], sizes = [2, 32], strides = [1, 1]} : vector<2x128xf32> to vector<2x32xf32>
    %209 = arith.negf %208 : vector<2x32xf32>
    %210 = math.exp %209 : vector<2x32xf32>
    %cst_38 = arith.constant 1.000000e+00 : f32
    %211 = vector.broadcast %cst_38 : f32 to vector<2x32xf32>
    %212 = arith.addf %211, %210 : vector<2x32xf32>
    %213 = arith.divf %211, %212 : vector<2x32xf32>
    %214 = vector.extract_strided_slice %207 {offsets = [0, 32], sizes = [2, 32], strides = [1, 1]} : vector<2x128xf32> to vector<2x32xf32>
    %215 = arith.negf %214 : vector<2x32xf32>
    %216 = math.exp %215 : vector<2x32xf32>
    %cst_39 = arith.constant 1.000000e+00 : f32
    %217 = vector.broadcast %cst_39 : f32 to vector<2x32xf32>
    %218 = arith.addf %217, %216 : vector<2x32xf32>
    %219 = arith.divf %217, %218 : vector<2x32xf32>
    %220 = vector.extract_strided_slice %207 {offsets = [0, 64], sizes = [2, 32], strides = [1, 1]} : vector<2x128xf32> to vector<2x32xf32>
    %221 = math.tanh %220 : vector<2x32xf32>
    %222 = vector.extract_strided_slice %207 {offsets = [0, 96], sizes = [2, 32], strides = [1, 1]} : vector<2x128xf32> to vector<2x32xf32>
    %223 = arith.negf %222 : vector<2x32xf32>
    %224 = math.exp %223 : vector<2x32xf32>
    %cst_40 = arith.constant 1.000000e+00 : f32
    %225 = vector.broadcast %cst_40 : f32 to vector<2x32xf32>
    %226 = arith.addf %225, %224 : vector<2x32xf32>
    %227 = arith.divf %225, %226 : vector<2x32xf32>
    %228 = arith.mulf %219, %202 : vector<2x32xf32>
    %229 = arith.mulf %213, %221 : vector<2x32xf32>
    %230 = arith.addf %228, %229 : vector<2x32xf32>
    %231 = math.tanh %230 : vector<2x32xf32>
    %232 = arith.mulf %227, %231 : vector<2x32xf32>
    %233 = tpu.concatenate %36, %64, %92, %120, %148, %176, %204, %232 in 0 : vector<2x32xf32>, vector<2x32xf32>, vector<2x32xf32>, vector<2x32xf32>, vector<2x32xf32>, vector<2x32xf32>, vector<2x32xf32>, vector<2x32xf32> -> vector<16x32xf32>
    %c0_41 = arith.constant 0 : index
    %c0_42 = arith.constant 0 : index
    %234 = vector.load %arg4[%c0_41, %c0_42] : memref<32x128xf32, #tpu.memory_space<vmem>>, vector<32x128xf32>
    %c0_43 = arith.constant 0 : index
    %c0_44 = arith.constant 0 : index
    %235 = vector.load %arg5[%c0_43, %c0_44] : memref<32x128xf32, #tpu.memory_space<vmem>>, vector<32x128xf32>
    %c0_45 = arith.constant 0 : index
    %c0_46 = arith.constant 0 : index
    %236 = vector.load %arg6[%c0_45, %c0_46] : memref<1x128xf32, #tpu.memory_space<vmem>>, vector<1x128xf32>
    %cst_47 = arith.constant dense<0.000000e+00> : vector<16x128xf32>
    %237 = tpu.matmul %233, %234, %cst_47 {dimension_numbers = #tpu.dot_dimension_numbers<[1], [0], [0], [1], [0, 0, 1, 1], [], []>} : vector<16x32xf32>, vector<32x128xf32>, vector<16x128xf32> -> vector<16x128xf32>
    %238 = vector.broadcast %236 : vector<1x128xf32> to vector<16x128xf32>
    %239 = arith.addf %237, %238 : vector<16x128xf32>
    %cst_48 = arith.constant 0.000000e+00 : f32
    %240 = vector.broadcast %cst_48 : f32 to vector<2x32xf32>
    %cst_49 = arith.constant 0.000000e+00 : f32
    %241 = vector.broadcast %cst_49 : f32 to vector<2x32xf32>
    %242 = vector.extract_strided_slice %239 {offsets = [0, 0], sizes = [2, 128], strides = [1, 1]} : vector<16x128xf32> to vector<2x128xf32>
    %cst_50 = arith.constant dense<0.000000e+00> : vector<2x128xf32>
    %243 = tpu.matmul %240, %235, %cst_50 {dimension_numbers = #tpu.dot_dimension_numbers<[1], [0], [0], [1], [0, 0, 1, 1], [], []>} : vector<2x32xf32>, vector<32x128xf32>, vector<2x128xf32> -> vector<2x128xf32>
    %244 = arith.addf %242, %243 : vector<2x128xf32>
    %245 = vector.extract_strided_slice %244 {offsets = [0, 0], sizes = [2, 32], strides = [1, 1]} : vector<2x128xf32> to vector<2x32xf32>
    %246 = arith.negf %245 : vector<2x32xf32>
    %247 = math.exp %246 : vector<2x32xf32>
    %cst_51 = arith.constant 1.000000e+00 : f32
    %248 = vector.broadcast %cst_51 : f32 to vector<2x32xf32>
    %249 = arith.addf %248, %247 : vector<2x32xf32>
    %250 = arith.divf %248, %249 : vector<2x32xf32>
    %251 = vector.extract_strided_slice %244 {offsets = [0, 32], sizes = [2, 32], strides = [1, 1]} : vector<2x128xf32> to vector<2x32xf32>
    %252 = arith.negf %251 : vector<2x32xf32>
    %253 = math.exp %252 : vector<2x32xf32>
    %cst_52 = arith.constant 1.000000e+00 : f32
    %254 = vector.broadcast %cst_52 : f32 to vector<2x32xf32>
    %255 = arith.addf %254, %253 : vector<2x32xf32>
    %256 = arith.divf %254, %255 : vector<2x32xf32>
    %257 = vector.extract_strided_slice %244 {offsets = [0, 64], sizes = [2, 32], strides = [1, 1]} : vector<2x128xf32> to vector<2x32xf32>
    %258 = math.tanh %257 : vector<2x32xf32>
    %259 = vector.extract_strided_slice %244 {offsets = [0, 96], sizes = [2, 32], strides = [1, 1]} : vector<2x128xf32> to vector<2x32xf32>
    %260 = arith.negf %259 : vector<2x32xf32>
    %261 = math.exp %260 : vector<2x32xf32>
    %cst_53 = arith.constant 1.000000e+00 : f32
    %262 = vector.broadcast %cst_53 : f32 to vector<2x32xf32>
    %263 = arith.addf %262, %261 : vector<2x32xf32>
    %264 = arith.divf %262, %263 : vector<2x32xf32>
    %265 = arith.mulf %256, %241 : vector<2x32xf32>
    %266 = arith.mulf %250, %258 : vector<2x32xf32>
    %267 = arith.addf %265, %266 : vector<2x32xf32>
    %268 = math.tanh %267 : vector<2x32xf32>
    %269 = arith.mulf %264, %268 : vector<2x32xf32>
    %270 = vector.extract_strided_slice %239 {offsets = [2, 0], sizes = [2, 128], strides = [1, 1]} : vector<16x128xf32> to vector<2x128xf32>
    %cst_54 = arith.constant dense<0.000000e+00> : vector<2x128xf32>
    %271 = tpu.matmul %269, %235, %cst_54 {dimension_numbers = #tpu.dot_dimension_numbers<[1], [0], [0], [1], [0, 0, 1, 1], [], []>} : vector<2x32xf32>, vector<32x128xf32>, vector<2x128xf32> -> vector<2x128xf32>
    %272 = arith.addf %270, %271 : vector<2x128xf32>
    %273 = vector.extract_strided_slice %272 {offsets = [0, 0], sizes = [2, 32], strides = [1, 1]} : vector<2x128xf32> to vector<2x32xf32>
    %274 = arith.negf %273 : vector<2x32xf32>
    %275 = math.exp %274 : vector<2x32xf32>
    %cst_55 = arith.constant 1.000000e+00 : f32
    %276 = vector.broadcast %cst_55 : f32 to vector<2x32xf32>
    %277 = arith.addf %276, %275 : vector<2x32xf32>
    %278 = arith.divf %276, %277 : vector<2x32xf32>
    %279 = vector.extract_strided_slice %272 {offsets = [0, 32], sizes = [2, 32], strides = [1, 1]} : vector<2x128xf32> to vector<2x32xf32>
    %280 = arith.negf %279 : vector<2x32xf32>
    %281 = math.exp %280 : vector<2x32xf32>
    %cst_56 = arith.constant 1.000000e+00 : f32
    %282 = vector.broadcast %cst_56 : f32 to vector<2x32xf32>
    %283 = arith.addf %282, %281 : vector<2x32xf32>
    %284 = arith.divf %282, %283 : vector<2x32xf32>
    %285 = vector.extract_strided_slice %272 {offsets = [0, 64], sizes = [2, 32], strides = [1, 1]} : vector<2x128xf32> to vector<2x32xf32>
    %286 = math.tanh %285 : vector<2x32xf32>
    %287 = vector.extract_strided_slice %272 {offsets = [0, 96], sizes = [2, 32], strides = [1, 1]} : vector<2x128xf32> to vector<2x32xf32>
    %288 = arith.negf %287 : vector<2x32xf32>
    %289 = math.exp %288 : vector<2x32xf32>
    %cst_57 = arith.constant 1.000000e+00 : f32
    %290 = vector.broadcast %cst_57 : f32 to vector<2x32xf32>
    %291 = arith.addf %290, %289 : vector<2x32xf32>
    %292 = arith.divf %290, %291 : vector<2x32xf32>
    %293 = arith.mulf %284, %267 : vector<2x32xf32>
    %294 = arith.mulf %278, %286 : vector<2x32xf32>
    %295 = arith.addf %293, %294 : vector<2x32xf32>
    %296 = math.tanh %295 : vector<2x32xf32>
    %297 = arith.mulf %292, %296 : vector<2x32xf32>
    %298 = vector.extract_strided_slice %239 {offsets = [4, 0], sizes = [2, 128], strides = [1, 1]} : vector<16x128xf32> to vector<2x128xf32>
    %cst_58 = arith.constant dense<0.000000e+00> : vector<2x128xf32>
    %299 = tpu.matmul %297, %235, %cst_58 {dimension_numbers = #tpu.dot_dimension_numbers<[1], [0], [0], [1], [0, 0, 1, 1], [], []>} : vector<2x32xf32>, vector<32x128xf32>, vector<2x128xf32> -> vector<2x128xf32>
    %300 = arith.addf %298, %299 : vector<2x128xf32>
    %301 = vector.extract_strided_slice %300 {offsets = [0, 0], sizes = [2, 32], strides = [1, 1]} : vector<2x128xf32> to vector<2x32xf32>
    %302 = arith.negf %301 : vector<2x32xf32>
    %303 = math.exp %302 : vector<2x32xf32>
    %cst_59 = arith.constant 1.000000e+00 : f32
    %304 = vector.broadcast %cst_59 : f32 to vector<2x32xf32>
    %305 = arith.addf %304, %303 : vector<2x32xf32>
    %306 = arith.divf %304, %305 : vector<2x32xf32>
    %307 = vector.extract_strided_slice %300 {offsets = [0, 32], sizes = [2, 32], strides = [1, 1]} : vector<2x128xf32> to vector<2x32xf32>
    %308 = arith.negf %307 : vector<2x32xf32>
    %309 = math.exp %308 : vector<2x32xf32>
    %cst_60 = arith.constant 1.000000e+00 : f32
    %310 = vector.broadcast %cst_60 : f32 to vector<2x32xf32>
    %311 = arith.addf %310, %309 : vector<2x32xf32>
    %312 = arith.divf %310, %311 : vector<2x32xf32>
    %313 = vector.extract_strided_slice %300 {offsets = [0, 64], sizes = [2, 32], strides = [1, 1]} : vector<2x128xf32> to vector<2x32xf32>
    %314 = math.tanh %313 : vector<2x32xf32>
    %315 = vector.extract_strided_slice %300 {offsets = [0, 96], sizes = [2, 32], strides = [1, 1]} : vector<2x128xf32> to vector<2x32xf32>
    %316 = arith.negf %315 : vector<2x32xf32>
    %317 = math.exp %316 : vector<2x32xf32>
    %cst_61 = arith.constant 1.000000e+00 : f32
    %318 = vector.broadcast %cst_61 : f32 to vector<2x32xf32>
    %319 = arith.addf %318, %317 : vector<2x32xf32>
    %320 = arith.divf %318, %319 : vector<2x32xf32>
    %321 = arith.mulf %312, %295 : vector<2x32xf32>
    %322 = arith.mulf %306, %314 : vector<2x32xf32>
    %323 = arith.addf %321, %322 : vector<2x32xf32>
    %324 = math.tanh %323 : vector<2x32xf32>
    %325 = arith.mulf %320, %324 : vector<2x32xf32>
    %326 = vector.extract_strided_slice %239 {offsets = [6, 0], sizes = [2, 128], strides = [1, 1]} : vector<16x128xf32> to vector<2x128xf32>
    %cst_62 = arith.constant dense<0.000000e+00> : vector<2x128xf32>
    %327 = tpu.matmul %325, %235, %cst_62 {dimension_numbers = #tpu.dot_dimension_numbers<[1], [0], [0], [1], [0, 0, 1, 1], [], []>} : vector<2x32xf32>, vector<32x128xf32>, vector<2x128xf32> -> vector<2x128xf32>
    %328 = arith.addf %326, %327 : vector<2x128xf32>
    %329 = vector.extract_strided_slice %328 {offsets = [0, 0], sizes = [2, 32], strides = [1, 1]} : vector<2x128xf32> to vector<2x32xf32>
    %330 = arith.negf %329 : vector<2x32xf32>
    %331 = math.exp %330 : vector<2x32xf32>
    %cst_63 = arith.constant 1.000000e+00 : f32
    %332 = vector.broadcast %cst_63 : f32 to vector<2x32xf32>
    %333 = arith.addf %332, %331 : vector<2x32xf32>
    %334 = arith.divf %332, %333 : vector<2x32xf32>
    %335 = vector.extract_strided_slice %328 {offsets = [0, 32], sizes = [2, 32], strides = [1, 1]} : vector<2x128xf32> to vector<2x32xf32>
    %336 = arith.negf %335 : vector<2x32xf32>
    %337 = math.exp %336 : vector<2x32xf32>
    %cst_64 = arith.constant 1.000000e+00 : f32
    %338 = vector.broadcast %cst_64 : f32 to vector<2x32xf32>
    %339 = arith.addf %338, %337 : vector<2x32xf32>
    %340 = arith.divf %338, %339 : vector<2x32xf32>
    %341 = vector.extract_strided_slice %328 {offsets = [0, 64], sizes = [2, 32], strides = [1, 1]} : vector<2x128xf32> to vector<2x32xf32>
    %342 = math.tanh %341 : vector<2x32xf32>
    %343 = vector.extract_strided_slice %328 {offsets = [0, 96], sizes = [2, 32], strides = [1, 1]} : vector<2x128xf32> to vector<2x32xf32>
    %344 = arith.negf %343 : vector<2x32xf32>
    %345 = math.exp %344 : vector<2x32xf32>
    %cst_65 = arith.constant 1.000000e+00 : f32
    %346 = vector.broadcast %cst_65 : f32 to vector<2x32xf32>
    %347 = arith.addf %346, %345 : vector<2x32xf32>
    %348 = arith.divf %346, %347 : vector<2x32xf32>
    %349 = arith.mulf %340, %323 : vector<2x32xf32>
    %350 = arith.mulf %334, %342 : vector<2x32xf32>
    %351 = arith.addf %349, %350 : vector<2x32xf32>
    %352 = math.tanh %351 : vector<2x32xf32>
    %353 = arith.mulf %348, %352 : vector<2x32xf32>
    %354 = vector.extract_strided_slice %239 {offsets = [8, 0], sizes = [2, 128], strides = [1, 1]} : vector<16x128xf32> to vector<2x128xf32>
    %cst_66 = arith.constant dense<0.000000e+00> : vector<2x128xf32>
    %355 = tpu.matmul %353, %235, %cst_66 {dimension_numbers = #tpu.dot_dimension_numbers<[1], [0], [0], [1], [0, 0, 1, 1], [], []>} : vector<2x32xf32>, vector<32x128xf32>, vector<2x128xf32> -> vector<2x128xf32>
    %356 = arith.addf %354, %355 : vector<2x128xf32>
    %357 = vector.extract_strided_slice %356 {offsets = [0, 0], sizes = [2, 32], strides = [1, 1]} : vector<2x128xf32> to vector<2x32xf32>
    %358 = arith.negf %357 : vector<2x32xf32>
    %359 = math.exp %358 : vector<2x32xf32>
    %cst_67 = arith.constant 1.000000e+00 : f32
    %360 = vector.broadcast %cst_67 : f32 to vector<2x32xf32>
    %361 = arith.addf %360, %359 : vector<2x32xf32>
    %362 = arith.divf %360, %361 : vector<2x32xf32>
    %363 = vector.extract_strided_slice %356 {offsets = [0, 32], sizes = [2, 32], strides = [1, 1]} : vector<2x128xf32> to vector<2x32xf32>
    %364 = arith.negf %363 : vector<2x32xf32>
    %365 = math.exp %364 : vector<2x32xf32>
    %cst_68 = arith.constant 1.000000e+00 : f32
    %366 = vector.broadcast %cst_68 : f32 to vector<2x32xf32>
    %367 = arith.addf %366, %365 : vector<2x32xf32>
    %368 = arith.divf %366, %367 : vector<2x32xf32>
    %369 = vector.extract_strided_slice %356 {offsets = [0, 64], sizes = [2, 32], strides = [1, 1]} : vector<2x128xf32> to vector<2x32xf32>
    %370 = math.tanh %369 : vector<2x32xf32>
    %371 = vector.extract_strided_slice %356 {offsets = [0, 96], sizes = [2, 32], strides = [1, 1]} : vector<2x128xf32> to vector<2x32xf32>
    %372 = arith.negf %371 : vector<2x32xf32>
    %373 = math.exp %372 : vector<2x32xf32>
    %cst_69 = arith.constant 1.000000e+00 : f32
    %374 = vector.broadcast %cst_69 : f32 to vector<2x32xf32>
    %375 = arith.addf %374, %373 : vector<2x32xf32>
    %376 = arith.divf %374, %375 : vector<2x32xf32>
    %377 = arith.mulf %368, %351 : vector<2x32xf32>
    %378 = arith.mulf %362, %370 : vector<2x32xf32>
    %379 = arith.addf %377, %378 : vector<2x32xf32>
    %380 = math.tanh %379 : vector<2x32xf32>
    %381 = arith.mulf %376, %380 : vector<2x32xf32>
    %382 = vector.extract_strided_slice %239 {offsets = [10, 0], sizes = [2, 128], strides = [1, 1]} : vector<16x128xf32> to vector<2x128xf32>
    %cst_70 = arith.constant dense<0.000000e+00> : vector<2x128xf32>
    %383 = tpu.matmul %381, %235, %cst_70 {dimension_numbers = #tpu.dot_dimension_numbers<[1], [0], [0], [1], [0, 0, 1, 1], [], []>} : vector<2x32xf32>, vector<32x128xf32>, vector<2x128xf32> -> vector<2x128xf32>
    %384 = arith.addf %382, %383 : vector<2x128xf32>
    %385 = vector.extract_strided_slice %384 {offsets = [0, 0], sizes = [2, 32], strides = [1, 1]} : vector<2x128xf32> to vector<2x32xf32>
    %386 = arith.negf %385 : vector<2x32xf32>
    %387 = math.exp %386 : vector<2x32xf32>
    %cst_71 = arith.constant 1.000000e+00 : f32
    %388 = vector.broadcast %cst_71 : f32 to vector<2x32xf32>
    %389 = arith.addf %388, %387 : vector<2x32xf32>
    %390 = arith.divf %388, %389 : vector<2x32xf32>
    %391 = vector.extract_strided_slice %384 {offsets = [0, 32], sizes = [2, 32], strides = [1, 1]} : vector<2x128xf32> to vector<2x32xf32>
    %392 = arith.negf %391 : vector<2x32xf32>
    %393 = math.exp %392 : vector<2x32xf32>
    %cst_72 = arith.constant 1.000000e+00 : f32
    %394 = vector.broadcast %cst_72 : f32 to vector<2x32xf32>
    %395 = arith.addf %394, %393 : vector<2x32xf32>
    %396 = arith.divf %394, %395 : vector<2x32xf32>
    %397 = vector.extract_strided_slice %384 {offsets = [0, 64], sizes = [2, 32], strides = [1, 1]} : vector<2x128xf32> to vector<2x32xf32>
    %398 = math.tanh %397 : vector<2x32xf32>
    %399 = vector.extract_strided_slice %384 {offsets = [0, 96], sizes = [2, 32], strides = [1, 1]} : vector<2x128xf32> to vector<2x32xf32>
    %400 = arith.negf %399 : vector<2x32xf32>
    %401 = math.exp %400 : vector<2x32xf32>
    %cst_73 = arith.constant 1.000000e+00 : f32
    %402 = vector.broadcast %cst_73 : f32 to vector<2x32xf32>
    %403 = arith.addf %402, %401 : vector<2x32xf32>
    %404 = arith.divf %402, %403 : vector<2x32xf32>
    %405 = arith.mulf %396, %379 : vector<2x32xf32>
    %406 = arith.mulf %390, %398 : vector<2x32xf32>
    %407 = arith.addf %405, %406 : vector<2x32xf32>
    %408 = math.tanh %407 : vector<2x32xf32>
    %409 = arith.mulf %404, %408 : vector<2x32xf32>
    %410 = vector.extract_strided_slice %239 {offsets = [12, 0], sizes = [2, 128], strides = [1, 1]} : vector<16x128xf32> to vector<2x128xf32>
    %cst_74 = arith.constant dense<0.000000e+00> : vector<2x128xf32>
    %411 = tpu.matmul %409, %235, %cst_74 {dimension_numbers = #tpu.dot_dimension_numbers<[1], [0], [0], [1], [0, 0, 1, 1], [], []>} : vector<2x32xf32>, vector<32x128xf32>, vector<2x128xf32> -> vector<2x128xf32>
    %412 = arith.addf %410, %411 : vector<2x128xf32>
    %413 = vector.extract_strided_slice %412 {offsets = [0, 0], sizes = [2, 32], strides = [1, 1]} : vector<2x128xf32> to vector<2x32xf32>
    %414 = arith.negf %413 : vector<2x32xf32>
    %415 = math.exp %414 : vector<2x32xf32>
    %cst_75 = arith.constant 1.000000e+00 : f32
    %416 = vector.broadcast %cst_75 : f32 to vector<2x32xf32>
    %417 = arith.addf %416, %415 : vector<2x32xf32>
    %418 = arith.divf %416, %417 : vector<2x32xf32>
    %419 = vector.extract_strided_slice %412 {offsets = [0, 32], sizes = [2, 32], strides = [1, 1]} : vector<2x128xf32> to vector<2x32xf32>
    %420 = arith.negf %419 : vector<2x32xf32>
    %421 = math.exp %420 : vector<2x32xf32>
    %cst_76 = arith.constant 1.000000e+00 : f32
    %422 = vector.broadcast %cst_76 : f32 to vector<2x32xf32>
    %423 = arith.addf %422, %421 : vector<2x32xf32>
    %424 = arith.divf %422, %423 : vector<2x32xf32>
    %425 = vector.extract_strided_slice %412 {offsets = [0, 64], sizes = [2, 32], strides = [1, 1]} : vector<2x128xf32> to vector<2x32xf32>
    %426 = math.tanh %425 : vector<2x32xf32>
    %427 = vector.extract_strided_slice %412 {offsets = [0, 96], sizes = [2, 32], strides = [1, 1]} : vector<2x128xf32> to vector<2x32xf32>
    %428 = arith.negf %427 : vector<2x32xf32>
    %429 = math.exp %428 : vector<2x32xf32>
    %cst_77 = arith.constant 1.000000e+00 : f32
    %430 = vector.broadcast %cst_77 : f32 to vector<2x32xf32>
    %431 = arith.addf %430, %429 : vector<2x32xf32>
    %432 = arith.divf %430, %431 : vector<2x32xf32>
    %433 = arith.mulf %424, %407 : vector<2x32xf32>
    %434 = arith.mulf %418, %426 : vector<2x32xf32>
    %435 = arith.addf %433, %434 : vector<2x32xf32>
    %436 = math.tanh %435 : vector<2x32xf32>
    %437 = arith.mulf %432, %436 : vector<2x32xf32>
    %438 = vector.extract_strided_slice %239 {offsets = [14, 0], sizes = [2, 128], strides = [1, 1]} : vector<16x128xf32> to vector<2x128xf32>
    %cst_78 = arith.constant dense<0.000000e+00> : vector<2x128xf32>
    %439 = tpu.matmul %437, %235, %cst_78 {dimension_numbers = #tpu.dot_dimension_numbers<[1], [0], [0], [1], [0, 0, 1, 1], [], []>} : vector<2x32xf32>, vector<32x128xf32>, vector<2x128xf32> -> vector<2x128xf32>
    %440 = arith.addf %438, %439 : vector<2x128xf32>
    %441 = vector.extract_strided_slice %440 {offsets = [0, 0], sizes = [2, 32], strides = [1, 1]} : vector<2x128xf32> to vector<2x32xf32>
    %442 = arith.negf %441 : vector<2x32xf32>
    %443 = math.exp %442 : vector<2x32xf32>
    %cst_79 = arith.constant 1.000000e+00 : f32
    %444 = vector.broadcast %cst_79 : f32 to vector<2x32xf32>
    %445 = arith.addf %444, %443 : vector<2x32xf32>
    %446 = arith.divf %444, %445 : vector<2x32xf32>
    %447 = vector.extract_strided_slice %440 {offsets = [0, 32], sizes = [2, 32], strides = [1, 1]} : vector<2x128xf32> to vector<2x32xf32>
    %448 = arith.negf %447 : vector<2x32xf32>
    %449 = math.exp %448 : vector<2x32xf32>
    %cst_80 = arith.constant 1.000000e+00 : f32
    %450 = vector.broadcast %cst_80 : f32 to vector<2x32xf32>
    %451 = arith.addf %450, %449 : vector<2x32xf32>
    %452 = arith.divf %450, %451 : vector<2x32xf32>
    %453 = vector.extract_strided_slice %440 {offsets = [0, 64], sizes = [2, 32], strides = [1, 1]} : vector<2x128xf32> to vector<2x32xf32>
    %454 = math.tanh %453 : vector<2x32xf32>
    %455 = vector.extract_strided_slice %440 {offsets = [0, 96], sizes = [2, 32], strides = [1, 1]} : vector<2x128xf32> to vector<2x32xf32>
    %456 = arith.negf %455 : vector<2x32xf32>
    %457 = math.exp %456 : vector<2x32xf32>
    %cst_81 = arith.constant 1.000000e+00 : f32
    %458 = vector.broadcast %cst_81 : f32 to vector<2x32xf32>
    %459 = arith.addf %458, %457 : vector<2x32xf32>
    %460 = arith.divf %458, %459 : vector<2x32xf32>
    %461 = arith.mulf %452, %435 : vector<2x32xf32>
    %462 = arith.mulf %446, %454 : vector<2x32xf32>
    %463 = arith.addf %461, %462 : vector<2x32xf32>
    %464 = math.tanh %463 : vector<2x32xf32>
    %465 = arith.mulf %460, %464 : vector<2x32xf32>
    %c0_82 = arith.constant 0 : index
    %c0_83 = arith.constant 0 : index
    %466 = vector.load %arg7[%c0_82, %c0_83] : memref<32x16xf32, #tpu.memory_space<vmem>>, vector<32x16xf32>
    %cst_84 = arith.constant dense<0.000000e+00> : vector<2x16xf32>
    %467 = tpu.matmul %465, %466, %cst_84 {dimension_numbers = #tpu.dot_dimension_numbers<[1], [0], [0], [1], [0, 0, 1, 1], [], []>} : vector<2x32xf32>, vector<32x16xf32>, vector<2x16xf32> -> vector<2x16xf32>
    %c0_85 = arith.constant 0 : index
    %c0_86 = arith.constant 0 : index
    %468 = vector.load %arg8[%c0_85, %c0_86] : memref<1x16xf32, #tpu.memory_space<vmem>>, vector<1x16xf32>
    %469 = vector.broadcast %468 : vector<1x16xf32> to vector<2x16xf32>
    %470 = arith.addf %467, %469 : vector<2x16xf32>
    %cst_87 = arith.constant 0.000000e+00 : f32
    %471 = vector.broadcast %cst_87 : f32 to vector<2x16xf32>
    %472 = arith.maximumf %470, %471 : vector<2x16xf32>
    %c0_88 = arith.constant 0 : index
    %c0_89 = arith.constant 0 : index
    %473 = vector.load %arg9[%c0_88, %c0_89] : memref<16x2xf32, #tpu.memory_space<vmem>>, vector<16x2xf32>
    %cst_90 = arith.constant dense<0.000000e+00> : vector<2x2xf32>
    %474 = tpu.matmul %472, %473, %cst_90 {dimension_numbers = #tpu.dot_dimension_numbers<[1], [0], [0], [1], [0, 0, 1, 1], [], []>} : vector<2x16xf32>, vector<16x2xf32>, vector<2x2xf32> -> vector<2x2xf32>
    %c0_91 = arith.constant 0 : index
    %c0_92 = arith.constant 0 : index
    %475 = vector.load %arg10[%c0_91, %c0_92] : memref<1x2xf32, #tpu.memory_space<vmem>>, vector<1x2xf32>
    %476 = vector.broadcast %475 : vector<1x2xf32> to vector<2x2xf32>
    %477 = arith.addf %474, %476 : vector<2x2xf32>
    %c0_93 = arith.constant 0 : index
    %c0_94 = arith.constant 0 : index
    %478 = vector.load %arg11[%c0_93, %c0_94] : memref<2x2xf32, #tpu.memory_space<vmem>>, vector<2x2xf32>
    tpu.vector_store %arg11[%c0_93, %c0_94], %477 {strides = array<i32>} : memref<2x2xf32, #tpu.memory_space<vmem>>, vector<2x2xf32>,
    return
  }
}

</mosaic_0001>

<bundles_post_ra>
// kernel: tpu_custom_call.1
= control target key start
LH: loop header
LB: loop body
LE: loop exit
PB: predicated region body
PF: predicated region fallthrough
CT: control target
= control target key end

     0   :  { %16 = vsyncpa [#allocation3], 0  ;;  %s3266_s0 = inlined_call_operand.vmem [shape: f32[16,4], index: 0, kind: input, shape index: {}]   ;;  %s3267_s1 = inlined_call_operand.hbm [shape: f32[4,128], index: 1, kind: input, shape index: {}]   ;;  %s3268_s2 = inlined_call_operand.vmem [shape: f32[32,128], index: 2, kind: input, shape index: {}]   ;;  %s3269_s3 = inlined_call_operand.hbm [shape: f32[1,128], index: 3, kind: input, shape index: {}]   ;;  %s3270_s4 = inlined_call_operand.vmem [shape: f32[32,128], index: 4, kind: input, shape index: {}]   ;;  %s3271_s5 = inlined_call_operand.vmem [shape: f32[32,128], index: 5, kind: input, shape index: {}]   ;;  %s3272_s6 = inlined_call_operand.hbm [shape: f32[1,128], index: 6, kind: input, shape index: {}]   ;;  %s3273_s7 = inlined_call_operand.vmem [shape: f32[32,16], index: 7, kind: input, shape index: {}]   ;;  %s3274_s8 = inlined_call_operand.vmem [shape: f32[1,16], index: 8, kind: input, shape index: {}]   ;;  %s3275_s9 = inlined_call_operand.vmem [shape: f32[16,2], index: 9, kind: input, shape index: {}]   ;;  %s3276_s10 = inlined_call_operand.vmem [shape: f32[1,2], index: 10, kind: input, shape index: {}]   ;;  %s3277_s11 = inlined_call_operand.hbm [shape: f32[2,2], index: 11, kind: output, shape index: {}]  }
   0x1   :  { %17 = vsyncpa [#allocation6], 0 }
   0x2   :  { %18 = vsyncpa [#allocation4], 0  ;;  %s2845_s17 = smov [#allocation5]   ;;  %s2846_s19 = smov [#allocation2]  }
   0x3   :  { %s39_s18 = sshll.u32 %s2845_s17, 4  ;;  %s27_s20 = sshll.u32 %s2846_s19, 4  ;;  %s40_s18 = int_to_ptr.vmem [resolvable:$true] %s39_s18  ;;  %s28_s20 = int_to_ptr.vmem [resolvable:$true] %s27_s20 }
   0x4   :  { %s2751_s23 = scalar_lea.hbm %s3269_s3, 16 }
   0x5   :  { %p2752_p0 = scmp.ne.s32.totalorder %s3269_s3, %s2751_s23  ;;  %p2755_p1 = scmp.lt.u32.totalorder %s2751_s23, %s3269_s3 }
   0x7   :  { %p2757_p2 = pnand %p2755_p1, %p2752_p0 }
   0x9   :  { %2760 = shalt.err (!%p2757_p2)
}
   0xa   :  { %s2761_s28 = scalar_lea.vmem %s40_s18, 16  ;;  %s2765_s29 = scalar_lea.vmem %s40_s18, 32 }
   0xb   :  { %p2762_p3 = scmp.ne.s32.totalorder %s40_s18, %s2761_s28  ;;  %p2766_p4 = scmp.lt.s32.totalorder %s40_s18, %s40_s18 }
   0xc   :  { %p2767_p5 = scmp.lt.s32.totalorder %s2765_s29, %s2761_s28 }
   0xe   :  { %p2768_p6 = por %p2767_p5, %p2766_p4 }
  0x10   :  { %p2769_p7 = pnand %p2768_p6, %p2762_p3 }
  0x12   :  { %2772 = shalt.err (!%p2769_p7)
}
  0x13   :  { %42 = dma.hbm_to_vmem [thread:$0]  %s3269_s3, 16, %s40_s18, [#allocation6]  }
  0x14   :  { %s2773_s15 = scalar_lea.hbm %s3267_s1, 64 }
  0x15   :  { %p2774_p8 = scmp.ne.s32.totalorder %s3267_s1, %s2773_s15  ;;  %p2777_p9 = scmp.lt.u32.totalorder %s2773_s15, %s3267_s1 }
  0x17   :  { %p2779_p10 = pnand %p2777_p9, %p2774_p8 }
  0x19   :  { %2782 = shalt.err (!%p2779_p10)
}
  0x1a   :  { %s2783_s22 = scalar_lea.vmem %s28_s20, 64  ;;  %p2788_p12 = scmp.lt.s32.totalorder %s28_s20, %s28_s20 }
  0x1b   :  { %p2784_p11 = scmp.ne.s32.totalorder %s28_s20, %s2783_s22  ;;  %p2789_p13 = scmp.lt.s32.totalorder %s2783_s22, %s2783_s22 }
  0x1d   :  { %p2790_p0 = por %p2789_p13, %p2788_p12 }
  0x1f   :  { %p2791_p1 = pnand %p2790_p0, %p2784_p11 }
  0x21   :  { %2794 = shalt.err (!%p2791_p1)
}
  0x22   :  { %30 = dma.hbm_to_vmem [thread:$0]  %s3267_s1, 64, %s28_s20, [#allocation3]  }
  0x23   :  { %s2847_s23 = smov [#allocation7]   ;;  %s2795_s27 = scalar_lea.hbm %s3272_s6, 16 }
  0x24   :  { %s53_s24 = sshll.u32 %s2847_s23, 4  ;;  %p2796_p2 = scmp.ne.s32.totalorder %s3272_s6, %s2795_s27  ;;  %s54_s24 = int_to_ptr.vmem [resolvable:$true] %s53_s24 }
  0x25   :  { %p2799_p3 = scmp.lt.u32.totalorder %s2795_s27, %s3272_s6 }
  0x27   :  { %p2801_p4 = pnand %p2799_p3, %p2796_p2 }
  0x29   :  { %2804 = shalt.err (!%p2801_p4)
}
  0x2a   :  { %s2805_s13 = scalar_lea.vmem %s54_s24, 16  ;;  %s2809_s1 = scalar_lea.vmem %s54_s24, 32 }
  0x2b   :  { %p2806_p5 = scmp.ne.s32.totalorder %s54_s24, %s2805_s13  ;;  %p2810_p6 = scmp.lt.s32.totalorder %s54_s24, %s54_s24 }
  0x2c   :  { %p2811_p7 = scmp.lt.s32.totalorder %s2809_s1, %s2805_s13 }
  0x2e   :  { %p2812_p8 = por %p2811_p7, %p2810_p6 }
  0x30   :  { %p2813_p9 = pnand %p2812_p8, %p2806_p5 }
  0x32   :  { %2816 = shalt.err (!%p2813_p9)
}
  0x33   :  { %56 = dma.hbm_to_vmem [thread:$0]  %s3272_s6, 16, %s54_s24, [#allocation6]  }
  0x34   :  { %2839 = dma.done.wait [#allocation3], 64  }
  0x35   :  { %2840 = vsyncadd [#allocation3], 4294967232 }
  0x36   :  { %2841 = dma.done.wait [#allocation6], 32  }
  0x37   :  { %2842 = vsyncadd [#allocation6], 4294967264  ;;  %v2848_v0 = vmov 0.0|0.0   ;;  %vm2849_vm0 = vmmov 0   ;;  %v2850_v1 = vmov 0.0   ;;  %vm95_vm1 = vcmask 1043456  }
  0x38   :  { %2501 = vmatprep.subr.bf16.mxu1 %v2848_v0  ;;  %2304 = vmatprep.mubr.msk.f32.mxu1 %vm2849_vm0, %v2850_v1  ;;  %vm88_vm2 = vcmask 31744   ;;  %v77_v2 = vld [vmem:[%s3268_s2] sm:$0xff]  ;;  %v78_v3 = vld [vmem:[%s3268_s2 + $0x8] sm:$0xff]  ;;  %v76_v4 = vld [vmem:[#allocation2] sm:$0xf]  ;;  %vm174_vm3 = vcmask 261120  }
  0x39   :  { %v2959_v5 = vpack.c.bf16 %v78_v3, %v77_v2  ;;  %2291 = vmatprep.subr.msk.mxu0 %vm95_vm1, %v76_v4  ;;  %v74_v6 = vld [vmem:[%s3266_s0] sm:$0xff]  ;;  %v75_v7 = vld [vmem:[%s3266_s0 + $0x8] sm:$0xff]  ;;  %v79_v8 = vld [vmem:[%s3268_s2 + $0x10] sm:$0xff]  ;;  %s2851_s0 = smov 64   ;;  %vm1017_vm4 = vcmask 1041408   ;;  %vm1020_vm5 = vcmask 1045504  }
  0x3a   :  { %2292 = vmatpush3.msk.msra.mxu0 %vm95_vm1, %v76_v4  ;;  %2293 = vmatprep.mubr.msk.f32.mxu0 %vm88_vm2, %v74_v6  ;;  %v80_v9 = vld [vmem:[%s3268_s2 + $0x18] sm:$0xff]  ;;  %v2153_v11 = vld [vmem:[#allocation5] ss:$0 sm:$0xff]  ;;  %s2852_s2 = smov 32   ;;  %vm2061_vm6 = vcmask 130048   ;;  %s2853_s12 = smov [#allocation8]  }
  0x3b   :  { %2503 = vmatpush3.bf16.msra.mxu1 %v2959_v5  ;;  %2294 = vmatmul.mubr.msk.f32.vlgmr.msra.gmra.mrb[0].mxu0 %vm88_vm2, %v75_v7  ;;  %v2976_v10 = vpack.c.bf16 %v80_v9, %v79_v8  ;;  %s2143_s13 = sshll.u32 %s2853_s12, 4  ;;  %vm2135_vm7 = vcmask 9216   ;;  %s2144_s13 = int_to_ptr.vmem [resolvable:$true] %s2143_s13 }
  0x3c   :  { %2504 = vmatprep.subr.bf16.mxu1 %v2848_v0  ;;  %2507 = vmatprep.subr.bf16.mxu0 %v2848_v0  ;;  %p2822_p11 = scmp.lt.s32.totalorder %s2144_s13, %s2144_s13 }
  0x3d   :  { %2509 = vmatpush3.bf16.msra.mxu0 %v2959_v5  ;;  %2315 = vmatprep.mubr.msk.f32.mxu0 %vm2849_vm0, %v2850_v1 }
  0x3e   :  { %2510 = vmatprep.subr.bf16.mxu0 %v2848_v0 }
  0x3f   :  { %2506 = vmatpush3.bf16.msra.mxu1 %v2976_v10 }
  0x40   :  { %2513 = vmatprep.subr.bf16.mxu1 %v2848_v0 }
  0x41   :  { %2512 = vmatpush3.bf16.msra.mxu0 %v2976_v10 }
  0x42   :  { %2305 = vmatmul.mubr.f32.vlgmr.msra.gmra.mrb[0].mxu1 %v2850_v1  ;;  %2519 = vmatprep.subr.bf16.mxu0 %v2848_v0 }
  0x43   :  { %2515 = vmatpush3.bf16.msra.mxu1 %v2959_v5  ;;  %2326 = vmatprep.mubr.msk.f32.mxu1 %vm2849_vm0, %v2850_v1 }
  0x44   :  { %2516 = vmatprep.subr.bf16.mxu1 %v2848_v0 }
  0x47   :  { %2518 = vmatpush3.bf16.msra.mxu1 %v2976_v10 }
  0x48   :  { %2525 = vmatprep.subr.bf16.mxu1 %v2848_v0 }
 0x10e   :  { %v2295_v12 = vpop.f32.mrb[0].mxu0 }
 0x10f   :  { %v2995_v13 = vadd.f32 %v2295_v12, %v2153_v11  ;;  %v165_v14 = vpop.f32.mrb[1].mxu0 }
 0x110   :  { %v2997_v15 = vadd.f32 %v2153_v11, %v165_v14 }
 0x115   :  { %v244_v16 = vpop.f32.mrb[0].mxu1 }
 0x116   :  { %v248_v17 = vadd.f32 %v244_v16, %v2997_v15  ;;  %v2306_v18 = vpop.f32.mrb[1].mxu1 }
 0x118   :  { %2623 = vtanh.f32 %v248_v17  ;;  %v2157_v20 = vmul.f32 -1.442695, %v248_v17 }
 0x11a   :  { %2625 = vpow2.f32 %v2157_v20 }
 0x122   :  { %v2624_v19 = vpop.eup %2623 }
 0x123   :  { %258 = vrot.lane.b32.xlu0 %v2624_v19, %s2851_s0 }
 0x124   :  { %v2626_v21 = vpop.eup %2625 }
 0x125   :  { %v252_v22 = vadd.f32 1.0, %v2626_v21 }
 0x127   :  { %2627 = vrcp.f32 %v252_v22 }
 0x131   :  { %v2628_v23 = vpop.eup %2627 }
 0x132   :  { %v256_v26 = vmul.f32 0.0, %v2628_v23 }
 0x195   :  { %v259_v24 = vpop.permute.xlu0 %258 }
 0x196   :  { %v261_v25 = vmul.f32 %v2628_v23, %v259_v24 }
 0x198   :  { %263 = vrot.lane.b32.xlu0 %v261_v25, %s2852_s2 }
 0x20a   :  { %v264_v27 = vpop.permute.xlu0 %263 }
 0x20b   :  { %v266_v28 = vadd.f32 %v264_v27, %v256_v26 }
 0x20d   :  { %2629 = vtanh.f32 %v266_v28  ;;  %v360_v44 = vrot.slane %v266_v28, 6 }
 0x217   :  { %v2630_v29 = vpop.eup %2629 }
 0x218   :  { %269 = vrot.lane.b32.xlu1 %v2630_v29, %s2851_s0 }
 0x28a   :  { %v270_v30 = vpop.permute.xlu1 %269 }
 0x28b   :  { %v3003_v31 = vmul.f32 %v2628_v23, %v270_v30 }
 0x28d   :  { %274 = vrot.lane.b32.xlu1 %v3003_v31, %s2852_s2 }
 0x2ff   :  { %v275_v32 = vpop.permute.xlu1 %274 }
 0x300   :  { %2316 = vmatmul.mubr.msk.f32.vlgmr.msra.gmra.mrb[2].mxu0 %vm174_vm3, %v275_v32 }
 0x301   :  { %2521 = vmatpush3.bf16.msra.mxu0 %v2959_v5  ;;  %2337 = vmatprep.mubr.msk.f32.mxu0 %vm2849_vm0, %v2850_v1 }
 0x302   :  { %2522 = vmatprep.subr.bf16.mxu0 %v2848_v0 }
 0x305   :  { %2524 = vmatpush3.bf16.msra.mxu0 %v2976_v10 }
 0x306   :  { %2531 = vmatprep.subr.bf16.mxu0 %v2848_v0 }
 0x3d3   :  { %v344_v33 = vpop.f32.mrb[2].mxu0 }
 0x3d4   :  { %v349_v34 = vrot.slane %v344_v33, 6  ;;  %v2317_v35 = vpop.f32.mrb[3].mxu0 }
 0x3d6   :  { %v351_v36 = vadd.f32 %v349_v34, %v2997_v15 }
 0x3d8   :  { %2631 = vtanh.f32 %v351_v36  ;;  %v2159_v38 = vmul.f32 -1.442695, %v351_v36 }
 0x3da   :  { %2633 = vpow2.f32 %v2159_v38 }
 0x3e2   :  { %v2632_v37 = vpop.eup %2631 }
 0x3e3   :  { %364 = vrot.lane.b32.xlu0 %v2632_v37, %s2851_s0 }
 0x3e4   :  { %v2634_v39 = vpop.eup %2633 }
 0x3e5   :  { %v355_v40 = vadd.f32 1.0, %v2634_v39 }
 0x3e7   :  { %2635 = vrcp.f32 %v355_v40 }
 0x3f1   :  { %v2636_v41 = vpop.eup %2635 }
 0x3f2   :  { %v362_v45 = vmul.f32 %v2636_v41, %v360_v44 }
 0x455   :  { %v365_v42 = vpop.permute.xlu0 %364 }
 0x456   :  { %v367_v43 = vmul.f32 %v2636_v41, %v365_v42 }
 0x458   :  { %369 = vrot.lane.b32.xlu1 %v367_v43, %s2852_s2 }
 0x4ca   :  { %v370_v46 = vpop.permute.xlu1 %369 }
 0x4cb   :  { %v372_v47 = vadd.f32 %v370_v46, %v362_v45 }
 0x4cd   :  { %2637 = vtanh.f32 %v372_v47  ;;  %v467_v2 = vrot.slane %v372_v47, 6 }
 0x4d7   :  { %v2638_v48 = vpop.eup %2637 }
 0x4d8   :  { %375 = vrot.lane.b32.xlu0 %v2638_v48, %s2851_s0 }
 0x54a   :  { %v376_v49 = vpop.permute.xlu0 %375 }
 0x54b   :  { %v378_v50 = vmul.f32 %v2636_v41, %v376_v49 }
 0x54d   :  { %v380_v51 = vrot.slane %v378_v50, 2  ;;  %v1018_v11 = vsel %vm1017_vm4, %v3003_v31, %v378_v50 }
 0x54f   :  { %381 = vrot.lane.b32.xlu1 %v380_v51, %s2852_s2 }
 0x5c1   :  { %v382_v52 = vpop.permute.xlu1 %381 }
 0x5c2   :  { %2327 = vmatmul.mubr.msk.f32.vlgmr.msra.gmra.mrb[2].mxu1 %vm174_vm3, %v382_v52 }
 0x5c3   :  { %2527 = vmatpush3.bf16.msra.mxu1 %v2959_v5  ;;  %2348 = vmatprep.mubr.msk.f32.mxu1 %vm2849_vm0, %v2850_v1 }
 0x5c4   :  { %2528 = vmatprep.subr.bf16.mxu1 %v2848_v0 }
 0x5c7   :  { %2530 = vmatpush3.bf16.msra.mxu1 %v2976_v10 }
 0x5c8   :  { %2537 = vmatprep.subr.bf16.mxu1 %v2848_v0 }
 0x695   :  { %v451_v53 = vpop.f32.mrb[2].mxu1 }
 0x696   :  { %v456_v54 = vrot.slane %v451_v53, 4  ;;  %v2328_v55 = vpop.f32.mrb[3].mxu1 }
 0x698   :  { %v458_v56 = vadd.f32 %v456_v54, %v2997_v15 }
 0x69a   :  { %2639 = vtanh.f32 %v458_v56  ;;  %v2161_v58 = vmul.f32 -1.442695, %v458_v56 }
 0x69c   :  { %2641 = vpow2.f32 %v2161_v58 }
 0x6a4   :  { %v2640_v57 = vpop.eup %2639 }
 0x6a5   :  { %471 = vrot.lane.b32.xlu0 %v2640_v57, %s2851_s0 }
 0x6a6   :  { %v2642_v59 = vpop.eup %2641 }
 0x6a7   :  { %v462_v60 = vadd.f32 1.0, %v2642_v59 }
 0x6a9   :  { %2643 = vrcp.f32 %v462_v60 }
 0x6b3   :  { %v2644_v61 = vpop.eup %2643 }
 0x6b4   :  { %v469_v3 = vmul.f32 %v2644_v61, %v467_v2 }
 0x717   :  { %v472_v62 = vpop.permute.xlu0 %471 }
 0x718   :  { %v474_v63 = vmul.f32 %v2644_v61, %v472_v62 }
 0x71a   :  { %476 = vrot.lane.b32.xlu1 %v474_v63, %s2852_s2 }
 0x78c   :  { %v477_v4 = vpop.permute.xlu1 %476 }
 0x78d   :  { %v479_v6 = vadd.f32 %v477_v4, %v469_v3 }
 0x78f   :  { %2645 = vtanh.f32 %v479_v6  ;;  %v574_v28 = vrot.slane %v479_v6, 6 }
 0x799   :  { %v2646_v7 = vpop.eup %2645 }
 0x79a   :  { %482 = vrot.lane.b32.xlu0 %v2646_v7, %s2851_s0 }
 0x80c   :  { %v483_v8 = vpop.permute.xlu0 %482 }
 0x80d   :  { %v485_v9 = vmul.f32 %v2644_v61, %v483_v8 }
 0x80f   :  { %v487_v12 = vrot.slane %v485_v9, 4  ;;  %v1019_v14 = vsel %vm95_vm1, %v1018_v11, %v485_v9 }
 0x811   :  { %488 = vrot.lane.b32.xlu1 %v487_v12, %s2852_s2 }
 0x883   :  { %v489_v16 = vpop.permute.xlu1 %488 }
 0x884   :  { %2338 = vmatmul.mubr.msk.f32.vlgmr.msra.gmra.mrb[4].mxu0 %vm174_vm3, %v489_v16 }
 0x885   :  { %2533 = vmatpush3.bf16.msra.mxu0 %v2959_v5  ;;  %2359 = vmatprep.mubr.msk.f32.mxu0 %vm2849_vm0, %v2850_v1 }
 0x886   :  { %2534 = vmatprep.subr.bf16.mxu0 %v2848_v0 }
 0x889   :  { %2536 = vmatpush3.bf16.msra.mxu0 %v2976_v10 }
 0x88a   :  { %2543 = vmatprep.subr.bf16.mxu0 %v2848_v0 }
 0x957   :  { %v558_v17 = vpop.f32.mrb[4].mxu0 }
 0x958   :  { %v563_v18 = vrot.slane %v558_v17, 2  ;;  %v2339_v19 = vpop.f32.mrb[5].mxu0 }
 0x95a   :  { %v565_v20 = vadd.f32 %v563_v18, %v2997_v15 }
 0x95c   :  { %2647 = vtanh.f32 %v565_v20  ;;  %v2163_v22 = vmul.f32 -1.442695, %v565_v20 }
 0x95e   :  { %2649 = vpow2.f32 %v2163_v22 }
 0x966   :  { %v2648_v21 = vpop.eup %2647 }
 0x967   :  { %578 = vrot.lane.b32.xlu0 %v2648_v21, %s2851_s0 }
 0x968   :  { %v2650_v23 = vpop.eup %2649 }
 0x969   :  { %v569_v24 = vadd.f32 1.0, %v2650_v23 }
 0x96b   :  { %2651 = vrcp.f32 %v569_v24 }
 0x975   :  { %v2652_v25 = vpop.eup %2651 }
 0x976   :  { %v576_v29 = vmul.f32 %v2652_v25, %v574_v28 }
 0x9d9   :  { %v579_v26 = vpop.permute.xlu0 %578 }
 0x9da   :  { %v581_v27 = vmul.f32 %v2652_v25, %v579_v26 }
 0x9dc   :  { %583 = vrot.lane.b32.xlu1 %v581_v27, %s2852_s2 }
 0xa4e   :  { %v584_v30 = vpop.permute.xlu1 %583 }
 0xa4f   :  { %v586_v31 = vadd.f32 %v584_v30, %v576_v29 }
 0xa51   :  { %2653 = vtanh.f32 %v586_v31  ;;  %v678_v47 = vrot.slane %v586_v31, 6 }
 0xa5b   :  { %v2654_v15 = vpop.eup %2653 }
 0xa5c   :  { %589 = vrot.lane.b32.xlu0 %v2654_v15, %s2851_s0 }
 0xace   :  { %v590_v32 = vpop.permute.xlu0 %589 }
 0xacf   :  { %v592_v33 = vmul.f32 %v2652_v25, %v590_v32 }
 0xad1   :  { %v594_v34 = vrot.slane %v592_v33, 6  ;;  %v3046_v35 = vsel %vm1020_vm5, %v1019_v14, %v592_v33 }
 0xad3   :  { %595 = vrot.lane.b32.xlu1 %v594_v34, %s2852_s2 }
 0xb45   :  { %v596_v36 = vpop.permute.xlu1 %595 }
 0xb46   :  { %2349 = vmatmul.mubr.msk.f32.vlgmr.msra.gmra.mrb[4].mxu1 %vm174_vm3, %v596_v36 }
 0xb47   :  { %2539 = vmatpush3.bf16.msra.mxu1 %v2959_v5  ;;  %2370 = vmatprep.mubr.msk.f32.mxu1 %vm2849_vm0, %v2850_v1 }
 0xb48   :  { %2540 = vmatprep.subr.bf16.mxu1 %v2848_v0 }
 0xb4b   :  { %2542 = vmatpush3.bf16.msra.mxu1 %v2976_v10 }
 0xc19   :  { %v665_v37 = vpop.f32.mrb[4].mxu1 }
 0xc1a   :  { %v669_v38 = vadd.f32 %v665_v37, %v2995_v13  ;;  %v2350_v39 = vpop.f32.mrb[5].mxu1 }
 0xc1c   :  { %2655 = vtanh.f32 %v669_v38  ;;  %v2165_v41 = vmul.f32 -1.442695, %v669_v38 }
 0xc1e   :  { %2657 = vpow2.f32 %v2165_v41 }
 0xc26   :  { %v2656_v40 = vpop.eup %2655 }
 0xc27   :  { %682 = vrot.lane.b32.xlu0 %v2656_v40, %s2851_s0 }
 0xc28   :  { %v2658_v42 = vpop.eup %2657 }
 0xc29   :  { %v673_v43 = vadd.f32 1.0, %v2658_v42 }
 0xc2b   :  { %2659 = vrcp.f32 %v673_v43 }
 0xc35   :  { %v2660_v44 = vpop.eup %2659 }
 0xc36   :  { %v680_v48 = vmul.f32 %v2660_v44, %v678_v47 }
 0xc99   :  { %v683_v45 = vpop.permute.xlu0 %682 }
 0xc9a   :  { %v685_v46 = vmul.f32 %v2660_v44, %v683_v45 }
 0xc9c   :  { %687 = vrot.lane.b32.xlu1 %v685_v46, %s2852_s2 }
 0xd0e   :  { %v688_v49 = vpop.permute.xlu1 %687 }
 0xd0f   :  { %v690_v50 = vadd.f32 %v688_v49, %v680_v48 }
 0xd11   :  { %2661 = vtanh.f32 %v690_v50 }
 0xd1b   :  { %v2662_v51 = vpop.eup %2661 }
 0xd1c   :  { %693 = vrot.lane.b32.xlu0 %v2662_v51, %s2851_s0 }
 0xd8e   :  { %v694_v52 = vpop.permute.xlu0 %693 }
 0xd8f   :  { %v3059_v53 = vmul.f32 %v2660_v44, %v694_v52  ;;  %v1025_v52 = vld [vmem:[%s3270_s4] sm:$0xff] }
 0xd91   :  { %698 = vrot.lane.b32.xlu1 %v3059_v53, %s2852_s2 }
 0xe03   :  { %v699_v54 = vpop.permute.xlu1 %698 }
 0xe04   :  { %2360 = vmatmul.mubr.msk.f32.vlgmr.msra.gmra.mrb[6].mxu0 %vm174_vm3, %v699_v54  ;;  %v1029_v54 = vld [vmem:[%s3271_s5] sm:$0xff] }
 0xe05   :  { %2545 = vmatpush3.bf16.msra.mxu0 %v2959_v5  ;;  %2381 = vmatprep.mubr.msk.f32.mxu0 %vm2849_vm0, %v2850_v1 }
 0xe06   :  { %2546 = vmatprep.subr.bf16.mxu0 %v2848_v0 }
 0xe09   :  { %2548 = vmatpush3.bf16.msra.mxu0 %v2976_v10  ;;  %v784_v10 = vrot.slane %v690_v50, 6 }
 0xe0a   :  { %2557 = vmatprep.subr.bf16.mxu0 %v2848_v0 }
 0xed7   :  { %v768_v55 = vpop.f32.mrb[6].mxu0 }
 0xed8   :  { %v773_v56 = vrot.slane %v768_v55, 6  ;;  %v2361_v57 = vpop.f32.mrb[7].mxu0  ;;  %v1030_v55 = vld [vmem:[%s3271_s5 + $0x8] sm:$0xff] }
 0xed9   :  { %v1028_v57 = vld [vmem:[%s3270_s4 + $0x18] sm:$0xff] }
 0xeda   :  { %v775_v58 = vadd.f32 %v773_v56, %v2995_v13  ;;  %v1027_v56 = vld [vmem:[%s3270_s4 + $0x10] sm:$0xff] }
 0xedc   :  { %2663 = vtanh.f32 %v775_v58  ;;  %v2167_v60 = vmul.f32 -1.442695, %v775_v58  ;;  %v3111_v58 = vpack.c.bf16 %v1030_v55, %v1029_v54 }
 0xede   :  { %2665 = vpow2.f32 %v2167_v60  ;;  %v1031_v60 = vld [vmem:[%s3271_s5 + $0x10] sm:$0xff] }
 0xee6   :  { %v2664_v59 = vpop.eup %2663 }
 0xee7   :  { %788 = vrot.lane.b32.xlu0 %v2664_v59, %s2851_s0  ;;  %v2553_v59 = vpack.c.bf16 %v1028_v57, %v1027_v56 }
 0xee8   :  { %v2666_v5 = vpop.eup %2665 }
 0xee9   :  { %v779_v61 = vadd.f32 1.0, %v2666_v5  ;;  %v1032_v5 = vld [vmem:[%s3271_s5 + $0x18] sm:$0xff] }
 0xeeb   :  { %2667 = vrcp.f32 %v779_v61  ;;  %v3120_v61 = vpack.c.bf16 %v1032_v5, %v1031_v60 }
 0xef5   :  { %v2668_v62 = vpop.eup %2667 }
 0xef6   :  { %v786_v3 = vmul.f32 %v2668_v62, %v784_v10 }
 0xf59   :  { %v789_v63 = vpop.permute.xlu0 %788 }
 0xf5a   :  { %v791_v2 = vmul.f32 %v2668_v62, %v789_v63 }
 0xf5c   :  { %793 = vrot.lane.b32.xlu1 %v791_v2, %s2852_s2 }
 0xfce   :  { %v794_v4 = vpop.permute.xlu1 %793 }
 0xfcf   :  { %v796_v6 = vadd.f32 %v794_v4, %v786_v3 }
 0xfd1   :  { %2669 = vtanh.f32 %v796_v6  ;;  %v891_v26 = vrot.slane %v796_v6, 6 }
 0xfdb   :  { %v2670_v7 = vpop.eup %2669 }
 0xfdc   :  { %799 = vrot.lane.b32.xlu0 %v2670_v7, %s2851_s0  ;;  %v2172_v7 = vld [vmem:[#allocation7] ss:$0 sm:$0xff] }
0x104e   :  { %v800_v8 = vpop.permute.xlu0 %799 }
0x104f   :  { %v802_v9 = vmul.f32 %v2668_v62, %v800_v8 }
0x1051   :  { %v804_v11 = vrot.slane %v802_v9, 2  ;;  %v1022_v32 = vsel %vm1017_vm4, %v3059_v53, %v802_v9  ;;  %v1026_v53 = vld [vmem:[%s3270_s4 + $0x8] sm:$0xff] }
0x1053   :  { %805 = vrot.lane.b32.xlu1 %v804_v11, %s2852_s2 }
0x10c5   :  { %v806_v12 = vpop.permute.xlu1 %805 }
0x10c6   :  { %2371 = vmatmul.mubr.msk.f32.vlgmr.msra.gmra.mrb[6].mxu1 %vm174_vm3, %v806_v12 }
0x1199   :  { %v875_v14 = vpop.f32.mrb[6].mxu1 }
0x119a   :  { %v880_v16 = vrot.slane %v875_v14, 4  ;;  %v2372_v17 = vpop.f32.mrb[7].mxu1 }
0x119c   :  { %v882_v18 = vadd.f32 %v880_v16, %v2995_v13 }
0x119e   :  { %2671 = vtanh.f32 %v882_v18  ;;  %v2169_v20 = vmul.f32 -1.442695, %v882_v18 }
0x11a0   :  { %2673 = vpow2.f32 %v2169_v20 }
0x11a8   :  { %v2672_v19 = vpop.eup %2671 }
0x11a9   :  { %895 = vrot.lane.b32.xlu0 %v2672_v19, %s2851_s0 }
0x11aa   :  { %v2674_v21 = vpop.eup %2673 }
0x11ab   :  { %v886_v22 = vadd.f32 1.0, %v2674_v21 }
0x11ad   :  { %2675 = vrcp.f32 %v886_v22 }
0x11b7   :  { %v2676_v23 = vpop.eup %2675 }
0x11b8   :  { %v893_v27 = vmul.f32 %v2676_v23, %v891_v26 }
0x121b   :  { %v896_v24 = vpop.permute.xlu0 %895 }
0x121c   :  { %v898_v25 = vmul.f32 %v2676_v23, %v896_v24 }
0x121e   :  { %900 = vrot.lane.b32.xlu1 %v898_v25, %s2852_s2 }
0x1290   :  { %v901_v28 = vpop.permute.xlu1 %900 }
0x1291   :  { %v903_v29 = vadd.f32 %v901_v28, %v893_v27 }
0x1293   :  { %2677 = vtanh.f32 %v903_v29  ;;  %v998_v48 = vrot.slane %v903_v29, 6 }
0x129d   :  { %v2678_v30 = vpop.eup %2677 }
0x129e   :  { %906 = vrot.lane.b32.xlu0 %v2678_v30, %s2851_s0 }
0x1310   :  { %v907_v31 = vpop.permute.xlu0 %906 }
0x1311   :  { %v909_v15 = vmul.f32 %v2676_v23, %v907_v31 }
0x1313   :  { %v911_v33 = vrot.slane %v909_v15, 4  ;;  %v1023_v34 = vsel %vm95_vm1, %v1022_v32, %v909_v15 }
0x1315   :  { %912 = vrot.lane.b32.xlu1 %v911_v33, %s2852_s2 }
0x1387   :  { %v913_v36 = vpop.permute.xlu1 %912 }
0x1388   :  { %2382 = vmatmul.mubr.msk.f32.vlgmr.msra.gmra.mrb[8].mxu0 %vm174_vm3, %v913_v36 }
0x1389   :  { %2403 = vmatprep.mubr.msk.f32.mxu0 %vm2849_vm0, %v2850_v1  ;;  %2559 = vmatpush3.bf16.msra.mxu0 %v3111_v58 }
0x138a   :  { %2560 = vmatprep.subr.bf16.mxu0 %v2848_v0 }
0x138d   :  { %2562 = vmatpush3.bf16.msra.mxu0 %v3120_v61 }
0x138e   :  { %2569 = vmatprep.subr.bf16.mxu0 %v2848_v0 }
0x1390   :  { %2404 = vmatmul.mubr.f32.vlgmr.msra.gmra.mrb[10].mxu0 %v2850_v1 }
0x1391   :  { %2571 = vmatpush3.bf16.msra.mxu0 %v3111_v58  ;;  %2425 = vmatprep.mubr.msk.f32.mxu0 %vm2849_vm0, %v2850_v1 }
0x1392   :  { %2572 = vmatprep.subr.bf16.mxu0 %v2848_v0 }
0x1395   :  { %2574 = vmatpush3.bf16.msra.mxu0 %v3120_v61 }
0x1396   :  { %2581 = vmatprep.subr.bf16.mxu0 %v2848_v0 }
0x145b   :  { %v982_v37 = vpop.f32.mrb[8].mxu0 }
0x145c   :  { %v987_v38 = vrot.slane %v982_v37, 2  ;;  %v2383_v39 = vpop.f32.mrb[9].mxu0 }
0x145e   :  { %v989_v40 = vadd.f32 %v987_v38, %v2995_v13 }
0x1460   :  { %2679 = vtanh.f32 %v989_v40  ;;  %v2171_v42 = vmul.f32 -1.442695, %v989_v40 }
0x1462   :  { %2681 = vpow2.f32 %v2171_v42 }
0x1463   :  { %v1191_v4 = vpop.f32.mrb[10].mxu0 }
0x1464   :  { %v2405_v6 = vpop.f32.mrb[11].mxu0 }
0x146a   :  { %v2680_v41 = vpop.eup %2679 }
0x146b   :  { %1002 = vrot.lane.b32.xlu0 %v2680_v41, %s2851_s0 }
0x146c   :  { %v2682_v43 = vpop.eup %2681 }
0x146d   :  { %v993_v44 = vadd.f32 1.0, %v2682_v43 }
0x146f   :  { %2683 = vrcp.f32 %v993_v44 }
0x1479   :  { %v2684_v45 = vpop.eup %2683 }
0x147a   :  { %v1000_v49 = vmul.f32 %v2684_v45, %v998_v48 }
0x14dd   :  { %v1003_v46 = vpop.permute.xlu0 %1002 }
0x14de   :  { %v1005_v47 = vmul.f32 %v2684_v45, %v1003_v46 }
0x14e0   :  { %1007 = vrot.lane.b32.xlu1 %v1005_v47, %s2852_s2 }
0x14e4   :  { %1042 = vrot.lane.b32.xlu1 %v3046_v35, %s2852_s2  ;;  %v2549_v35 = vpack.c.bf16 %v1026_v53, %v1025_v52 }
0x14e6   :  { %2550 = vmatprep.subr.bf16.mxu1 %v2549_v35 }
0x14e7   :  { %2552 = vmatpush3.bf16.msra.mxu1 %v2549_v35 }
0x14e8   :  { %2554 = vmatprep.subr.bf16.mxu1 %v2553_v59 }
0x14eb   :  { %2556 = vmatpush3.bf16.msra.mxu1 %v2553_v59 }
0x14ec   :  { %2563 = vmatprep.subr.bf16.mxu1 %v2848_v0 }
0x1552   :  { %v1008_v13 = vpop.permute.xlu1 %1007 }
0x1553   :  { %v1010_v50 = vadd.f32 %v1008_v13, %v1000_v49 }
0x1555   :  { %2685 = vtanh.f32 %v1010_v50 }
0x1556   :  { %v1043_v51 = vpop.permute.xlu1 %1042 }
0x1557   :  { %2392 = vmatprep.mubr.msk.f32.mxu1 %vm174_vm3, %v1043_v51 }
0x155f   :  { %v2686_v62 = vpop.eup %2685 }
0x1560   :  { %1013 = vrot.lane.b32.xlu0 %v2686_v62, %s2851_s0 }
0x15d2   :  { %v1014_v63 = vpop.permute.xlu0 %1013 }
0x15d3   :  { %v1016_v2 = vmul.f32 %v2684_v45, %v1014_v63 }
0x15d5   :  { %v1024_v10 = vsel %vm1020_vm5, %v1023_v34, %v1016_v2 }
0x15d6   :  { %1044 = vrot.lane.b32.xlu0 %v1024_v10, %s2852_s2 }
0x1648   :  { %v1045_v3 = vpop.permute.xlu0 %1044 }
0x1649   :  { %2393 = vmatmul.mubr.msk.f32.vlgmr.msra.gmra.mrb[8].mxu1 %vm174_vm3, %v1045_v3 }
0x164a   :  { %2565 = vmatpush3.bf16.msra.mxu1 %v3111_v58  ;;  %2414 = vmatprep.mubr.msk.f32.mxu1 %vm2849_vm0, %v2850_v1 }
0x164b   :  { %2566 = vmatprep.subr.bf16.mxu1 %v2848_v0 }
0x164e   :  { %2568 = vmatpush3.bf16.msra.mxu1 %v3120_v61 }
0x164f   :  { %2575 = vmatprep.subr.bf16.mxu1 %v2848_v0 }
0x171c   :  { %v2394_v8 = vpop.f32.mrb[8].mxu1 }
0x171d   :  { %v3143_v9 = vadd.f32 %v2394_v8, %v2172_v7  ;;  %v1116_v11 = vpop.f32.mrb[9].mxu1 }
0x171e   :  { %v3145_v12 = vadd.f32 %v2172_v7, %v1116_v11 }
0x1720   :  { %v1195_v14 = vadd.f32 %v1191_v4, %v3145_v12 }
0x1722   :  { %2687 = vtanh.f32 %v1195_v14  ;;  %v2175_v17 = vmul.f32 -1.442695, %v1195_v14 }
0x1724   :  { %2689 = vpow2.f32 %v2175_v17 }
0x172c   :  { %v2688_v16 = vpop.eup %2687 }
0x172d   :  { %1205 = vrot.lane.b32.xlu1 %v2688_v16, %s2851_s0 }
0x172e   :  { %v2690_v18 = vpop.eup %2689 }
0x172f   :  { %v1199_v19 = vadd.f32 1.0, %v2690_v18 }
0x1731   :  { %2691 = vrcp.f32 %v1199_v19 }
0x173b   :  { %v2692_v20 = vpop.eup %2691 }
0x173c   :  { %v1203_v23 = vmul.f32 0.0, %v2692_v20 }
0x179f   :  { %v1206_v21 = vpop.permute.xlu1 %1205 }
0x17a0   :  { %v1208_v22 = vmul.f32 %v2692_v20, %v1206_v21 }
0x17a2   :  { %1210 = vrot.lane.b32.xlu0 %v1208_v22, %s2852_s2 }
0x1814   :  { %v1211_v24 = vpop.permute.xlu0 %1210 }
0x1815   :  { %v1213_v25 = vadd.f32 %v1211_v24, %v1203_v23 }
0x1817   :  { %2693 = vtanh.f32 %v1213_v25  ;;  %v1307_v41 = vrot.slane %v1213_v25, 6 }
0x1821   :  { %v2694_v26 = vpop.eup %2693 }
0x1822   :  { %1216 = vrot.lane.b32.xlu1 %v2694_v26, %s2851_s0 }
0x1894   :  { %v1217_v27 = vpop.permute.xlu1 %1216 }
0x1895   :  { %v1219_v28 = vmul.f32 %v2692_v20, %v1217_v27 }
0x1897   :  { %1221 = vrot.lane.b32.xlu0 %v1219_v28, %s2852_s2 }
0x1909   :  { %v1222_v29 = vpop.permute.xlu0 %1221 }
0x190a   :  { %2415 = vmatmul.mubr.msk.f32.vlgmr.msra.gmra.mrb[10].mxu1 %vm174_vm3, %v1222_v29 }
0x190b   :  { %2577 = vmatpush3.bf16.msra.mxu1 %v3111_v58  ;;  %2436 = vmatprep.mubr.msk.f32.mxu1 %vm2849_vm0, %v2850_v1 }
0x190c   :  { %2578 = vmatprep.subr.bf16.mxu1 %v2848_v0 }
0x190f   :  { %2580 = vmatpush3.bf16.msra.mxu1 %v3120_v61 }
0x1910   :  { %2587 = vmatprep.subr.bf16.mxu1 %v2848_v0 }
0x19dd   :  { %v1291_v30 = vpop.f32.mrb[10].mxu1 }
0x19de   :  { %v1296_v31 = vrot.slane %v1291_v30, 6  ;;  %v2416_v15 = vpop.f32.mrb[11].mxu1 }
0x19e0   :  { %v1298_v32 = vadd.f32 %v1296_v31, %v3145_v12 }
0x19e2   :  { %2695 = vtanh.f32 %v1298_v32  ;;  %v2177_v34 = vmul.f32 -1.442695, %v1298_v32 }
0x19e4   :  { %2697 = vpow2.f32 %v2177_v34 }
0x19ec   :  { %v2696_v33 = vpop.eup %2695 }
0x19ed   :  { %1311 = vrot.lane.b32.xlu1 %v2696_v33, %s2851_s0 }
0x19ee   :  { %v2698_v36 = vpop.eup %2697 }
0x19ef   :  { %v1302_v37 = vadd.f32 1.0, %v2698_v36 }
0x19f1   :  { %2699 = vrcp.f32 %v1302_v37 }
0x19fb   :  { %v2700_v38 = vpop.eup %2699 }
0x19fc   :  { %v1309_v42 = vmul.f32 %v2700_v38, %v1307_v41 }
0x1a5f   :  { %v1312_v39 = vpop.permute.xlu1 %1311 }
0x1a60   :  { %v1314_v40 = vmul.f32 %v2700_v38, %v1312_v39 }
0x1a62   :  { %1316 = vrot.lane.b32.xlu0 %v1314_v40, %s2852_s2 }
0x1ad4   :  { %v1317_v43 = vpop.permute.xlu0 %1316 }
0x1ad5   :  { %v1319_v44 = vadd.f32 %v1317_v43, %v1309_v42 }
0x1ad7   :  { %2701 = vtanh.f32 %v1319_v44  ;;  %v1414_v60 = vrot.slane %v1319_v44, 6 }
0x1ae1   :  { %v2702_v45 = vpop.eup %2701 }
0x1ae2   :  { %1322 = vrot.lane.b32.xlu1 %v2702_v45, %s2851_s0 }
0x1b54   :  { %v1323_v46 = vpop.permute.xlu1 %1322 }
0x1b55   :  { %v1325_v47 = vmul.f32 %v2700_v38, %v1323_v46 }
0x1b57   :  { %v1327_v48 = vrot.slane %v1325_v47, 2 }
0x1b59   :  { %1328 = vrot.lane.b32.xlu0 %v1327_v48, %s2852_s2 }
0x1bcb   :  { %v1329_v49 = vpop.permute.xlu0 %1328 }
0x1bcc   :  { %2426 = vmatmul.mubr.msk.f32.vlgmr.msra.gmra.mrb[12].mxu0 %vm174_vm3, %v1329_v49 }
0x1bcd   :  { %2583 = vmatpush3.bf16.msra.mxu0 %v3111_v58  ;;  %2447 = vmatprep.mubr.msk.f32.mxu0 %vm2849_vm0, %v2850_v1 }
0x1bce   :  { %2584 = vmatprep.subr.bf16.mxu0 %v2848_v0 }
0x1bd1   :  { %2586 = vmatpush3.bf16.msra.mxu0 %v3120_v61 }
0x1bd2   :  { %2593 = vmatprep.subr.bf16.mxu0 %v2848_v0 }
0x1c9f   :  { %v1398_v13 = vpop.f32.mrb[12].mxu0 }
0x1ca0   :  { %v1403_v50 = vrot.slane %v1398_v13, 4  ;;  %v2427_v51 = vpop.f32.mrb[13].mxu0 }
0x1ca2   :  { %v1405_v52 = vadd.f32 %v1403_v50, %v3145_v12 }
0x1ca4   :  { %2703 = vtanh.f32 %v1405_v52  ;;  %v2179_v54 = vmul.f32 -1.442695, %v1405_v52 }
0x1ca6   :  { %2705 = vpow2.f32 %v2179_v54 }
0x1cae   :  { %v2704_v53 = vpop.eup %2703 }
0x1caf   :  { %1418 = vrot.lane.b32.xlu1 %v2704_v53, %s2851_s0 }
0x1cb0   :  { %v2706_v35 = vpop.eup %2705 }
0x1cb1   :  { %v1409_v55 = vadd.f32 1.0, %v2706_v35 }
0x1cb3   :  { %2707 = vrcp.f32 %v1409_v55 }
0x1cbd   :  { %v2708_v56 = vpop.eup %2707 }
0x1cbe   :  { %v1416_v5 = vmul.f32 %v2708_v56, %v1414_v60 }
0x1d21   :  { %v1419_v57 = vpop.permute.xlu1 %1418 }
0x1d22   :  { %v1421_v59 = vmul.f32 %v2708_v56, %v1419_v57 }
0x1d24   :  { %1423 = vrot.lane.b32.xlu0 %v1421_v59, %s2852_s2 }
0x1d96   :  { %v1424_v62 = vpop.permute.xlu0 %1423 }
0x1d97   :  { %v1426_v63 = vadd.f32 %v1424_v62, %v1416_v5 }
0x1d99   :  { %2709 = vtanh.f32 %v1426_v63  ;;  %v1521_v23 = vrot.slane %v1426_v63, 6 }
0x1da3   :  { %v2710_v2 = vpop.eup %2709 }
0x1da4   :  { %1429 = vrot.lane.b32.xlu1 %v2710_v2, %s2851_s0 }
0x1e16   :  { %v1430_v10 = vpop.permute.xlu1 %1429 }
0x1e17   :  { %v1432_v3 = vmul.f32 %v2708_v56, %v1430_v10 }
0x1e19   :  { %v1434_v4 = vrot.slane %v1432_v3, 4 }
0x1e1b   :  { %1435 = vrot.lane.b32.xlu0 %v1434_v4, %s2852_s2 }
0x1e8d   :  { %v1436_v6 = vpop.permute.xlu0 %1435 }
0x1e8e   :  { %2437 = vmatmul.mubr.msk.f32.vlgmr.msra.gmra.mrb[12].mxu1 %vm174_vm3, %v1436_v6 }
0x1e8f   :  { %2589 = vmatpush3.bf16.msra.mxu1 %v3111_v58  ;;  %2458 = vmatprep.mubr.msk.f32.mxu1 %vm2849_vm0, %v2850_v1 }
0x1e90   :  { %2590 = vmatprep.subr.bf16.mxu1 %v2848_v0 }
0x1e93   :  { %2592 = vmatpush3.bf16.msra.mxu1 %v3120_v61 }
0x1e94   :  { %2599 = vmatprep.subr.bf16.mxu1 %v2848_v0 }
0x1f61   :  { %v1505_v7 = vpop.f32.mrb[12].mxu1 }
0x1f62   :  { %v1510_v8 = vrot.slane %v1505_v7, 2  ;;  %v2438_v11 = vpop.f32.mrb[13].mxu1 }
0x1f64   :  { %v1512_v14 = vadd.f32 %v1510_v8, %v3145_v12 }
0x1f66   :  { %2711 = vtanh.f32 %v1512_v14  ;;  %v2181_v17 = vmul.f32 -1.442695, %v1512_v14 }
0x1f68   :  { %2713 = vpow2.f32 %v2181_v17 }
0x1f70   :  { %v2712_v16 = vpop.eup %2711 }
0x1f71   :  { %1525 = vrot.lane.b32.xlu1 %v2712_v16, %s2851_s0 }
0x1f72   :  { %v2714_v18 = vpop.eup %2713 }
0x1f73   :  { %v1516_v19 = vadd.f32 1.0, %v2714_v18 }
0x1f75   :  { %2715 = vrcp.f32 %v1516_v19 }
0x1f7f   :  { %v2716_v20 = vpop.eup %2715 }
0x1f80   :  { %v1523_v24 = vmul.f32 %v2716_v20, %v1521_v23 }
0x1fe3   :  { %v1526_v21 = vpop.permute.xlu1 %1525 }
0x1fe4   :  { %v1528_v22 = vmul.f32 %v2716_v20, %v1526_v21 }
0x1fe6   :  { %1530 = vrot.lane.b32.xlu0 %v1528_v22, %s2852_s2 }
0x2058   :  { %v1531_v25 = vpop.permute.xlu0 %1530 }
0x2059   :  { %v1533_v26 = vadd.f32 %v1531_v25, %v1523_v24 }
0x205b   :  { %2717 = vtanh.f32 %v1533_v26  ;;  %v1625_v41 = vrot.slane %v1533_v26, 6 }
0x2065   :  { %v2718_v12 = vpop.eup %2717 }
0x2066   :  { %1536 = vrot.lane.b32.xlu1 %v2718_v12, %s2851_s0 }
0x20d8   :  { %v1537_v27 = vpop.permute.xlu1 %1536 }
0x20d9   :  { %v1539_v28 = vmul.f32 %v2716_v20, %v1537_v27 }
0x20db   :  { %v1541_v29 = vrot.slane %v1539_v28, 6 }
0x20dd   :  { %1542 = vrot.lane.b32.xlu0 %v1541_v29, %s2852_s2 }
0x214f   :  { %v1543_v30 = vpop.permute.xlu0 %1542 }
0x2150   :  { %2448 = vmatmul.mubr.msk.f32.vlgmr.msra.gmra.mrb[14].mxu0 %vm174_vm3, %v1543_v30 }
0x2151   :  { %2595 = vmatpush3.bf16.msra.mxu0 %v3111_v58  ;;  %2469 = vmatprep.mubr.msk.f32.mxu0 %vm2849_vm0, %v2850_v1 }
0x2152   :  { %2596 = vmatprep.subr.bf16.mxu0 %v2848_v0 }
0x2155   :  { %2598 = vmatpush3.bf16.msra.mxu0 %v3120_v61 }
0x2156   :  { %2605 = vmatprep.subr.bf16.mxu0 %v2848_v0 }
0x2223   :  { %v1612_v31 = vpop.f32.mrb[14].mxu0 }
0x2224   :  { %v1616_v15 = vadd.f32 %v1612_v31, %v3143_v9  ;;  %v2449_v32 = vpop.f32.mrb[15].mxu0 }
0x2226   :  { %2719 = vtanh.f32 %v1616_v15  ;;  %v2183_v34 = vmul.f32 -1.442695, %v1616_v15 }
0x2228   :  { %2721 = vpow2.f32 %v2183_v34 }
0x2230   :  { %v2720_v33 = vpop.eup %2719 }
0x2231   :  { %1629 = vrot.lane.b32.xlu1 %v2720_v33, %s2851_s0 }
0x2232   :  { %v2722_v36 = vpop.eup %2721 }
0x2233   :  { %v1620_v37 = vadd.f32 1.0, %v2722_v36 }
0x2235   :  { %2723 = vrcp.f32 %v1620_v37 }
0x223f   :  { %v2724_v38 = vpop.eup %2723 }
0x2240   :  { %v1627_v42 = vmul.f32 %v2724_v38, %v1625_v41 }
0x22a3   :  { %v1630_v39 = vpop.permute.xlu1 %1629 }
0x22a4   :  { %v1632_v40 = vmul.f32 %v2724_v38, %v1630_v39 }
0x22a6   :  { %1634 = vrot.lane.b32.xlu0 %v1632_v40, %s2852_s2 }
0x2318   :  { %v1635_v43 = vpop.permute.xlu0 %1634 }
0x2319   :  { %v1637_v44 = vadd.f32 %v1635_v43, %v1627_v42  ;;  %v1965_v42 = vld [vmem:[%s3273_s7 + $0x8] sm:$0xff]  ;;  %v1966_v43 = vld [vmem:[%s3273_s7 + $0x10] sm:$0xff] }
0x231b   :  { %2725 = vtanh.f32 %v1637_v44 }
0x2325   :  { %v2726_v45 = vpop.eup %2725 }
0x2326   :  { %1640 = vrot.lane.b32.xlu1 %v2726_v45, %s2851_s0  ;;  %v1967_v45 = vld [vmem:[%s3273_s7 + $0x18] sm:$0xff] }
0x2398   :  { %v1641_v46 = vpop.permute.xlu1 %1640 }
0x2399   :  { %v1643_v47 = vmul.f32 %v2724_v38, %v1641_v46  ;;  %v2609_v46 = vpack.c.bf16 %v1967_v45, %v1966_v43 }
0x239b   :  { %1645 = vrot.lane.b32.xlu0 %v1643_v47, %s2852_s2 }
0x240d   :  { %v1646_v48 = vpop.permute.xlu0 %1645 }
0x240e   :  { %2459 = vmatmul.mubr.msk.f32.vlgmr.msra.gmra.mrb[14].mxu1 %vm174_vm3, %v1646_v48 }
0x240f   :  { %2601 = vmatpush3.bf16.msra.mxu1 %v3111_v58  ;;  %2480 = vmatprep.mubr.msk.f32.mxu1 %vm2849_vm0, %v2850_v1 }
0x2410   :  { %2602 = vmatprep.subr.bf16.mxu1 %v2848_v0 }
0x2413   :  { %2604 = vmatpush3.bf16.msra.mxu1 %v3120_v61  ;;  %v1731_v61 = vrot.slane %v1637_v44, 6 }
0x2414   :  { %2611 = vmatprep.subr.bf16.mxu1 %v2848_v0 }
0x24e1   :  { %v1715_v49 = vpop.f32.mrb[14].mxu1 }
0x24e2   :  { %v1720_v13 = vrot.slane %v1715_v49, 6  ;;  %v2460_v50 = vpop.f32.mrb[15].mxu1 }
0x24e4   :  { %v1722_v51 = vadd.f32 %v1720_v13, %v3143_v9 }
0x24e6   :  { %2727 = vtanh.f32 %v1722_v51  ;;  %v2185_v53 = vmul.f32 -1.442695, %v1722_v51  ;;  %v2052_v51 = vld [vmem:[%s3275_s9] sm:$0xff] }
0x24e8   :  { %2729 = vpow2.f32 %v2185_v53  ;;  %v2190_v53 = vld [vmem:[%s3274_s8] ss:$0 sm:$0xff] }
0x24f0   :  { %v2728_v52 = vpop.eup %2727 }
0x24f1   :  { %1735 = vrot.lane.b32.xlu1 %v2728_v52, %s2851_s0 }
0x24f2   :  { %v2730_v58 = vpop.eup %2729 }
0x24f3   :  { %v1726_v54 = vadd.f32 1.0, %v2730_v58 }
0x24f5   :  { %2731 = vrcp.f32 %v1726_v54 }
0x24ff   :  { %v2732_v35 = vpop.eup %2731 }
0x2500   :  { %v1733_v57 = vmul.f32 %v2732_v35, %v1731_v61 }
0x2563   :  { %v1736_v55 = vpop.permute.xlu1 %1735 }
0x2564   :  { %v1738_v56 = vmul.f32 %v2732_v35, %v1736_v55 }
0x2566   :  { %1740 = vrot.lane.b32.xlu0 %v1738_v56, %s2852_s2  ;;  %v2192_v56 = vld [vmem:[%s3276_s10] ss:$0 sm:$0xff] }
0x25d8   :  { %v1741_v59 = vpop.permute.xlu0 %1740 }
0x25d9   :  { %v1743_v60 = vadd.f32 %v1741_v59, %v1733_v57 }
0x25db   :  { %2733 = vtanh.f32 %v1743_v60  ;;  %v1838_v20 = vrot.slane %v1743_v60, 6 }
0x25e5   :  { %v2734_v5 = vpop.eup %2733 }
0x25e6   :  { %1746 = vrot.lane.b32.xlu1 %v2734_v5, %s2851_s0 }
0x2658   :  { %v1747_v62 = vpop.permute.xlu1 %1746 }
0x2659   :  { %v1749_v63 = vmul.f32 %v2732_v35, %v1747_v62 }
0x265b   :  { %v1751_v2 = vrot.slane %v1749_v63, 2 }
0x265d   :  { %1752 = vrot.lane.b32.xlu0 %v1751_v2, %s2852_s2 }
0x26cf   :  { %v1753_v10 = vpop.permute.xlu0 %1752 }
0x26d0   :  { %2470 = vmatmul.mubr.msk.f32.vlgmr.msra.gmra.mrb[16].mxu0 %vm174_vm3, %v1753_v10 }
0x26d1   :  { %2491 = vmatprep.mubr.msk.f32.mxu0 %vm2849_vm0, %v2850_v1 }
0x27a3   :  { %v1822_v3 = vpop.f32.mrb[16].mxu0 }
0x27a4   :  { %v1827_v4 = vrot.slane %v1822_v3, 4  ;;  %v2471_v6 = vpop.f32.mrb[17].mxu0 }
0x27a6   :  { %v1829_v7 = vadd.f32 %v1827_v4, %v3143_v9 }
0x27a8   :  { %2735 = vtanh.f32 %v1829_v7  ;;  %v2187_v11 = vmul.f32 -1.442695, %v1829_v7 }
0x27aa   :  { %2737 = vpow2.f32 %v2187_v11 }
0x27b2   :  { %v2736_v8 = vpop.eup %2735 }
0x27b3   :  { %1842 = vrot.lane.b32.xlu1 %v2736_v8, %s2851_s0 }
0x27b4   :  { %v2738_v14 = vpop.eup %2737 }
0x27b5   :  { %v1833_v16 = vadd.f32 1.0, %v2738_v14 }
0x27b7   :  { %2739 = vrcp.f32 %v1833_v16 }
0x27c1   :  { %v2740_v17 = vpop.eup %2739 }
0x27c2   :  { %v1840_v21 = vmul.f32 %v2740_v17, %v1838_v20 }
0x2825   :  { %v1843_v18 = vpop.permute.xlu1 %1842 }
0x2826   :  { %v1845_v19 = vmul.f32 %v2740_v17, %v1843_v18 }
0x2828   :  { %1847 = vrot.lane.b32.xlu0 %v1845_v19, %s2852_s2 }
0x289a   :  { %v1848_v22 = vpop.permute.xlu0 %1847 }
0x289b   :  { %v1850_v23 = vadd.f32 %v1848_v22, %v1840_v21 }
0x289d   :  { %2741 = vtanh.f32 %v1850_v23 }
0x28a7   :  { %v2742_v24 = vpop.eup %2741 }
0x28a8   :  { %1853 = vrot.lane.b32.xlu1 %v2742_v24, %s2851_s0 }
0x291a   :  { %v1854_v25 = vpop.permute.xlu1 %1853 }
0x291b   :  { %v1856_v26 = vmul.f32 %v2740_v17, %v1854_v25 }
0x291d   :  { %v1858_v12 = vrot.slane %v1856_v26, 4 }
0x291f   :  { %1859 = vrot.lane.b32.xlu0 %v1858_v12, %s2852_s2 }
0x2991   :  { %v1860_v27 = vpop.permute.xlu0 %1859 }
0x2992   :  { %2481 = vmatmul.mubr.msk.f32.vlgmr.msra.gmra.mrb[16].mxu1 %vm174_vm3, %v1860_v27 }
0x2993   :  { %2498 = vmatprep.mubr.msk.f32.mxu1 %vm2849_vm0, %v2850_v1  ;;  %v1945_v1 = vrot.slane %v1850_v23, 6 }
0x2a65   :  { %v1929_v28 = vpop.f32.mrb[16].mxu1 }
0x2a66   :  { %v1934_v29 = vrot.slane %v1929_v28, 2  ;;  %v2482_v30 = vpop.f32.mrb[17].mxu1 }
0x2a68   :  { %v1936_v31 = vadd.f32 %v1934_v29, %v3143_v9  ;;  %v1964_v9 = vld [vmem:[%s3273_s7] sm:$0xff] }
0x2a69   :  { %v2606_v44 = vpack.c.bf16 %v1965_v42, %v1964_v9 }
0x2a6a   :  { %2743 = vtanh.f32 %v1936_v31  ;;  %v2189_v32 = vmul.f32 -1.442695, %v1936_v31 }
0x2a6b   :  { %2607 = vmatpush3.bf16.msra.mxu0 %v2606_v44 }
0x2a6c   :  { %2745 = vpow2.f32 %v2189_v32  ;;  %2608 = vmatprep.subr.bf16.mxu0 %v2848_v0  ;;  %v2053_v0 = vld [vmem:[%s3275_s9 + $0x8] sm:$0xff]  ;;  %s2817_s9 = scalar_lea.vmem %s2144_s13, 32 }
0x2a6d   :  { %v2612_v52 = vpack.c.bf16 %v2053_v0, %v2052_v51  ;;  %p2818_p10 = scmp.ne.s32.totalorder %s2144_s13, %s2817_s9  ;;  %p2823_p12 = scmp.lt.s32.totalorder %s2817_s9, %s2817_s9 }
0x2a6f   :  { %2610 = vmatpush3.bf16.msra.mxu0 %v2609_v46  ;;  %2613 = vmatpush3.bf16.msra.mxu1 %v2612_v52  ;;  %p2824_p13 = por %p2823_p12, %p2822_p11 }
0x2a71   :  { %p2825_p0 = pnand %p2824_p13, %p2818_p10 }
0x2a74   :  { %v2744_v15 = vpop.eup %2743 }
0x2a75   :  { %1949 = vrot.lane.b32.xlu1 %v2744_v15, %s2851_s0 }
0x2a76   :  { %v2746_v33 = vpop.eup %2745 }
0x2a77   :  { %v1940_v34 = vadd.f32 1.0, %v2746_v33 }
0x2a79   :  { %2747 = vrcp.f32 %v1940_v34 }
0x2a83   :  { %v2748_v36 = vpop.eup %2747 }
0x2a84   :  { %v1947_v39 = vmul.f32 %v2748_v36, %v1945_v1 }
0x2ae7   :  { %v1950_v37 = vpop.permute.xlu1 %1949 }
0x2ae8   :  { %v1952_v38 = vmul.f32 %v2748_v36, %v1950_v37 }
0x2aea   :  { %1954 = vrot.lane.b32.xlu0 %v1952_v38, %s2852_s2 }
0x2b5c   :  { %v1955_v40 = vpop.permute.xlu0 %1954 }
0x2b5d   :  { %v1957_v41 = vadd.f32 %v1955_v40, %v1947_v39 }
0x2b5f   :  { %2749 = vtanh.f32 %v1957_v41 }
0x2b69   :  { %v2750_v47 = vpop.eup %2749 }
0x2b6a   :  { %1960 = vrot.lane.b32.xlu1 %v2750_v47, %s2851_s0 }
0x2bdc   :  { %v1961_v48 = vpop.permute.xlu1 %1960 }
0x2bdd   :  { %v1963_v49 = vmul.f32 %v2748_v36, %v1961_v48 }
0x2bdf   :  { %v1976_v13 = vrot.slane %v1963_v49, 6 }
0x2be1   :  { %1977 = vrot.lane.b32.xlu0 %v1976_v13, %s2852_s2 }
0x2c53   :  { %v1978_v50 = vpop.permute.xlu0 %1977 }
0x2c54   :  { %2492 = vmatmul.mubr.msk.f32.vlgmr.msra.gmra.mrb[18].mxu0 %vm174_vm3, %v1978_v50 }
0x2d27   :  { %v2047_v58 = vpop.f32.mrb[18].mxu0 }
0x2d28   :  { %v2048_v54 = vadd.f32 %v2190_v53, %v2047_v58  ;;  %v2493_v35 = vpop.f32.mrb[19].mxu0 }
0x2d2a   :  { %v2051_v55 = vmax.f32 %v2048_v54, 0.0 }
0x2d2c   :  { %2499 = vmatmul.mubr.msk.f32.vlgmr.msra.gmra.mrb[18].mxu1 %vm2061_vm6, %v2051_v55 }
0x2dff   :  { %v2131_v61 = vpop.f32.mrb[18].mxu1 }
0x2e00   :  { %v2132_v57 = vadd.f32 %v2192_v56, %v2131_v61  ;;  %v2500_v59 = vpop.f32.mrb[19].mxu1 }
0x2e02   :  { %2136 = vst.msk [vmem:[#allocation8] sm:$0x3] %vm2135_vm7, %v2132_v57 }
0x2e03   :  { %2828 = shalt.err (!%p2825_p0)
}
0x2e04   :  { %s2829_s20 = scalar_lea.hbm %s3277_s11, 32 }
0x2e05   :  { %p2830_p1 = scmp.ne.s32.totalorder %s3277_s11, %s2829_s20  ;;  %p2833_p2 = scmp.lt.u32.totalorder %s2829_s20, %s3277_s11 }
0x2e07   :  { %p2835_p3 = pnand %p2833_p2, %p2830_p1 }
0x2e09   :  { %2838 = shalt.err (!%p2835_p3)
}
0x2e0a   :  { %2146 = dma.vmem_to_hbm [thread:$0]  %s2144_s13, 32, %s3277_s11, [#allocation4]  }
0x2e0b   :  { %2843 = dma.done.wait [#allocation4], 32  }
0x2e0c   :  { %2844 = vsyncadd [#allocation4], 4294967264 }
0x2e0d   :  { %2150 = vsyncpa [#allocation3], 1 }
0x2e0e   :  { %2151 = vsyncpa [#allocation6], 1 }
0x2e0f   :  { %2152 = vsyncpa [#allocation4], 1 }

</bundles_post_ra>
